<compile_context>
chip_gen: v6e
topology: v6e:2x2x1
jax: 0.10.0
libtpu: 0.0.40
codegen_flags: <defaults>
</compile_context>

<pallas_src>
import math
import functools

import numpy as np
import jax
import jax.numpy as jnp
from jax.experimental import pallas as pl
from jax.experimental.pallas import tpu as pltpu


def _vmem_limit_bytes():
    """Per-generation scoped-VMEM limit: ~3/4 of physical, capped at 100 MiB
    (~= 48 MiB on v7x's 64 MiB, ~96-100 MiB on v5e/v6e's 128 MiB)."""
    try:
        info = pltpu.get_tpu_info()
        for name in ("vmem_capacity_bytes", "vmem_size_bytes", "vmem_bytes"):
            cap = getattr(info, name, None)
            if cap:
                return int(min(cap * 3 // 4, 100 * 1024 * 1024))
    except Exception:
        pass
    return 48 * 1024 * 1024


_VMEM_LIMIT = _vmem_limit_bytes()

# Lv at or below this uses the scatter+MXU sampler; above it the gather sampler
# (the scatter's VALU cost is O(tq*Lv*H*K) and saturates the vector-ALU slot at DETR scale).
_SCATTER_MAX_LV = 2048


def _row_tile(n, cap):
    """Fixed row tile: min(cap, round_up(n, 8)); grids use pl.cdiv so ragged tails are
    handled by Pallas (all kernels here are row-independent, so padded rows are dropped
    on write)."""
    return int(min(cap, ((n + 7) // 8) * 8))


# ----------------------------------------------------------------------------------
# Kernel 1: value projection + padding mask
# ----------------------------------------------------------------------------------

def _value_proj_kernel(x_ref, w_ref, b_ref, keep_ref, o_ref):
    x = x_ref[...].astype(jnp.bfloat16)                       # bf16 MXU operands
    y = jnp.dot(x, w_ref[...], preferred_element_type=jnp.float32) + b_ref[...]
    # Reference: value = Linear(value); value.masked_fill_(mask, 0) -> multiply AFTER
    # the bias add (masked rows are exactly zero).
    o_ref[...] = (y * keep_ref[...]).astype(o_ref.dtype)


def pallas_value_proj(x, w_t_bf16, b2d, keep):
    """x: (N, D) f32, w_t: (D, D) bf16, b2d: (1, D) f32, keep: (N, 1) -> (N, D) bf16."""
    N, Din = x.shape
    Dout = w_t_bf16.shape[1]
    tm = _row_tile(N, 1024)
    return pl.pallas_call(
        _value_proj_kernel,
        out_shape=jax.ShapeDtypeStruct((N, Dout), jnp.bfloat16),
        grid=(pl.cdiv(N, tm),),
        in_specs=[
            pl.BlockSpec((tm, Din), lambda i: (i, 0)),
            pl.BlockSpec((Din, Dout), lambda i: (0, 0)),
            pl.BlockSpec((1, Dout), lambda i: (0, 0)),
            pl.BlockSpec((tm, 1), lambda i: (i, 0)),
        ],
        out_specs=pl.BlockSpec((tm, Dout), lambda i: (i, 0)),
        compiler_params=pltpu.CompilerParams(
            dimension_semantics=("parallel",),
            vmem_limit_bytes=_VMEM_LIMIT),
    )(x, w_t_bf16, b2d, keep)


# ----------------------------------------------------------------------------------
# Kernel 2: fused query-side projections (per-head softmax + box offsets)
# ----------------------------------------------------------------------------------

def make_query_proj_kernel(num_head, group):
    def kernel(q_ref, aw_ref, ab_ref, bw_ref, bb_ref, attn_ref, box_ref):
        q = q_ref[...].astype(jnp.bfloat16)
        logits = jnp.dot(q, aw_ref[...], preferred_element_type=jnp.float32) + ab_ref[...]
        # Per-head softmax with a per-head max (robust if one head's logits are uniformly
        # far below another's).  Note pl.reciprocal(approx=True): rows sum to 1 only to
        # ~1e-3 relative, consistent with the bf16 MXU path.
        segs = []
        for h in range(num_head):
            lg = logits[:, h * group:(h + 1) * group]
            m = jnp.max(lg, axis=-1, keepdims=True)
            e = jnp.exp(lg - m)                                # f32 softmax math (EUP)
            denom = jnp.sum(e, axis=-1, keepdims=True)
            segs.append(e * pl.reciprocal(denom, approx=True))
        attn_ref[...] = jnp.concatenate(segs, axis=1).astype(attn_ref.dtype)
        # Box-offset linear, reusing the same resident q tile.
        box = jnp.dot(q, bw_ref[...], preferred_element_type=jnp.float32) + bb_ref[...]
        box_ref[...] = box.astype(box_ref.dtype)
    return kernel


def pallas_query_proj(q, attn_w_t, attn_b, box_w_t, box_b, num_head):
    """q: (N, D) -> (per-head softmax attn (N, H*G), box offsets (N, H*L*4))."""
    N, D = q.shape
    HG = attn_w_t.shape[1]
    HB = box_w_t.shape[1]
    group = HG // num_head
    tm = _row_tile(N, 512)
    kernel = make_query_proj_kernel(num_head, group)
    return pl.pallas_call(
        kernel,
        out_shape=(jax.ShapeDtypeStruct((N, HG), jnp.float32),
                   jax.ShapeDtypeStruct((N, HB), jnp.float32)),
        grid=(pl.cdiv(N, tm),),
        in_specs=[
            pl.BlockSpec((tm, D), lambda i: (i, 0)),
            pl.BlockSpec((D, HG), lambda i: (0, 0)),
            pl.BlockSpec((1, HG), lambda i: (0, 0)),
            pl.BlockSpec((D, HB), lambda i: (0, 0)),
            pl.BlockSpec((1, HB), lambda i: (0, 0)),
        ],
        out_specs=(pl.BlockSpec((tm, HG), lambda i: (i, 0)),
                   pl.BlockSpec((tm, HB), lambda i: (i, 0))),
        compiler_params=pltpu.CompilerParams(
            dimension_semantics=("parallel",),
            vmem_limit_bytes=_VMEM_LIMIT),
    )(q, attn_w_t, attn_b, box_w_t, box_b)


# ----------------------------------------------------------------------------------
# Kernel 3a: gather-based bilinear sampling + output projection (default for large Lv)
# ----------------------------------------------------------------------------------

def make_gather_sample_kernel(num_head, head_dim, K, Lq, tq):
    HK = num_head * K

    def kernel(idx_sref, w_ref, v_hbm, ow_ref, ob_ref, o_ref,
               v_vmem, gk_ref, samp_ref, sem):
        b = pl.program_id(0)
        i = pl.program_id(1)
        Lv = v_vmem.shape[0]

        # Single-buffered resident value block: one DMA per batch (program_id(1)==0).
        @pl.when(i == 0)
        def _():
            cp = pltpu.make_async_copy(v_hbm.at[b], v_vmem, sem)
            cp.start()
            cp.wait()

        def q_body(q, carry):
            qg = jnp.minimum(i * tq + q, Lq - 1)               # clamp ragged tail rows

            def s_body(sidx, c):
                vi = idx_sref[b, qg, sidx]                      # scalar read from SMEM
                vi = jnp.minimum(jnp.maximum(vi, 0), Lv - 1)    # guard OOB VMEM access
                gk_ref[pl.ds(sidx, 1), :] = v_vmem[pl.ds(vi, 1), :]
                return c

            jax.lax.fori_loop(0, HK, s_body, 0, unroll=8)

            wrow = w_ref[pl.ds(q, 1), :].astype(jnp.bfloat16)   # (1, H*K) combined weights
            parts = []
            for h in range(num_head):
                # Weighted sum over K corners == tiny MXU matmul; keep only this head's
                # lane segment of the D-wide gathered rows.
                acc = jnp.dot(wrow[:, h * K:(h + 1) * K],
                              gk_ref[h * K:(h + 1) * K, :],
                              preferred_element_type=jnp.float32)          # (1, D)
                parts.append(acc[:, h * head_dim:(h + 1) * head_dim])
            samp_ref[pl.ds(q, 1), :] = jnp.concatenate(parts, axis=1)      # lane-dense row
            return carry

        jax.lax.fori_loop(0, tq, q_body, 0)

        out = jnp.dot(samp_ref[...].astype(jnp.bfloat16), ow_ref[...],
                      preferred_element_type=jnp.float32) + ob_ref[...]
        o_ref[...] = out.astype(o_ref.dtype)

    return kernel


def pallas_box_sample_gather(w_comb, idx, v_bf16, out_w_t, out_b, num_head, head_dim):
    """Gather sampler: idx/w_comb (B, Lq, H*K); v_bf16 (B, Lv, D) -> out_proj(sampled)."""
    B, Lq, HK = w_comb.shape
    Lv, D = v_bf16.shape[1], v_bf16.shape[2]
    K = HK // num_head
    tq = _row_tile(Lq, 64)
    kernel = make_gather_sample_kernel(num_head, head_dim, K, Lq, tq)
    # TODO(synk): at very large B*Lq the whole idx array no longer fits SMEM; switch the
    # scalar-prefetch operand to a per-tile SMEM BlockSpec.
    grid_spec = pltpu.PrefetchScalarGridSpec(
        num_scalar_prefetch=1,
        grid=(B, pl.cdiv(Lq, tq)),
        in_specs=[
            pl.BlockSpec((None, tq, HK), lambda b, i, idx_ref: (b, i, 0)),
            pl.BlockSpec(memory_space=pl.ANY),                  # value stays in HBM
            pl.BlockSpec((D, D), lambda b, i, idx_ref: (0, 0)),
            pl.BlockSpec((1, D), lambda b, i, idx_ref: (0, 0)),
        ],
        out_specs=pl.BlockSpec((None, tq, D), lambda b, i, idx_ref: (b, i, 0)),
        scratch_shapes=[
            pltpu.VMEM((Lv, D), jnp.bfloat16),                  # single-buffered value
            pltpu.VMEM((HK, D), jnp.bfloat16),                  # per-query gathered rows
            pltpu.VMEM((tq, D), jnp.float32),                   # sampled tile
            pltpu.SemaphoreType.DMA,
        ],
    )
    return pl.pallas_call(
        kernel,
        out_shape=jax.ShapeDtypeStruct((B, Lq, D), jnp.float32),
        grid_spec=grid_spec,
        compiler_params=pltpu.CompilerParams(
            # Megacore split on B so each core copies the value block once per batch.
            dimension_semantics=("parallel", "arbitrary"),
            vmem_limit_bytes=_VMEM_LIMIT),
    )(idx, w_comb, v_bf16, out_w_t, out_b)


# ----------------------------------------------------------------------------------
# Kernel 3b: scatter + MXU bilinear sampling (fallback for small Lv)
# ----------------------------------------------------------------------------------

def make_scatter_sample_kernel(num_head, head_dim, K):
    def kernel(w_ref, idx_ref, v_hbm, ow_ref, ob_ref, o_ref, v_vmem, sem):
        b = pl.program_id(0)

        @pl.when(pl.program_id(1) == 0)
        def _():
            cp = pltpu.make_async_copy(v_hbm.at[b], v_vmem, sem)
            cp.start()
            cp.wait()

        Lv = v_vmem.shape[0]
        lane = jax.lax.broadcasted_iota(jnp.int32, (1, Lv), 1)  # (1, Lv): broadcast compare
        w_all = w_ref[...]
        idx_all = idx_ref[...]
        tq = w_all.shape[0]
        parts = []
        for h in range(num_head):
            s = jnp.zeros((tq, Lv), jnp.float32)
            for k in range(K):                                  # bounded (tq, Lv) carry
                hk = h * K + k
                match = idx_all[:, hk:hk + 1] == lane
                s = s + jnp.where(match, w_all[:, hk:hk + 1], 0.0)
            parts.append(jnp.dot(s.astype(jnp.bfloat16),
                                 v_vmem[:, h * head_dim:(h + 1) * head_dim],
                                 preferred_element_type=jnp.float32))
        samp = jnp.concatenate(parts, axis=1)                   # heads fused in registers
        out = jnp.dot(samp.astype(jnp.bfloat16), ow_ref[...],
                      preferred_element_type=jnp.float32) + ob_ref[...]
        o_ref[...] = out.astype(o_ref.dtype)

    return kernel


def pallas_box_sample_scatter(w_comb, idx, v_bf16, out_w_t, out_b, num_head, head_dim):
    """Scatter sampler (Lv <= ~2k): one-hot scatter into (tq, Lv), one MXU matmul/head."""
    B, Lq, HK = w_comb.shape
    Lv, D = v_bf16.shape[1], v_bf16.shape[2]
    K = HK // num_head
    tq = _row_tile(Lq, 64)                                      # bounds the (tq, Lv) scratch
    kernel = make_scatter_sample_kernel(num_head, head_dim, K)
    return pl.pallas_call(
        kernel,
        out_shape=jax.ShapeDtypeStruct((B, Lq, D), jnp.float32),
        grid=(B, pl.cdiv(Lq, tq)),
        in_specs=[
            pl.BlockSpec((None, tq, HK), lambda b, i: (b, i, 0)),
            pl.BlockSpec((None, tq, HK), lambda b, i: (b, i, 0)),
            pl.BlockSpec(memory_space=pl.ANY),                  # value stays in HBM
            pl.BlockSpec((D, D), lambda b, i: (0, 0)),
            pl.BlockSpec((1, D), lambda b, i: (0, 0)),
        ],
        out_specs=pl.BlockSpec((None, tq, D), lambda b, i: (b, i, 0)),
        scratch_shapes=[pltpu.VMEM((Lv, D), jnp.bfloat16),      # single-buffered value
                        pltpu.SemaphoreType.DMA],
        compiler_params=pltpu.CompilerParams(
            dimension_semantics=("parallel", "arbitrary"),
            vmem_limit_bytes=_VMEM_LIMIT),
    )(w_comb, idx, v_bf16, out_w_t, out_b)


# ----------------------------------------------------------------------------------
# Glue: bilinear corner decomposition (grid_sample, align_corners=False, zero padding)
# ----------------------------------------------------------------------------------

def build_corner_weights(grid, attn, v_shapes, v_starts):
    """grid: (B,Lq,H,L,P,2) normalized (x, y); attn: (B,Lq,H,L,P).
    Returns flat value indices and combined (attn * bilinear) weights, (B,Lq,H,K)."""
    B, Lq, H, L, P, _ = grid.shape
    idx_list, w_list = [], []
    for l, (Hl, Wl) in enumerate(v_shapes):
        s = v_starts[l]
        loc = grid[:, :, :, l]                   # (B, Lq, H, P, 2)
        aw = attn[:, :, :, l]                    # (B, Lq, H, P)
        px = loc[..., 0] * Wl - 0.5
        py = loc[..., 1] * Hl - 0.5
        x0 = jnp.floor(px)
        y0 = jnp.floor(py)
        fx = px - x0
        fy = py - y0
        x0i = x0.astype(jnp.int32)
        y0i = y0.astype(jnp.int32)
        corners = [
            (0, 0, (1.0 - fy) * (1.0 - fx)),
            (0, 1, (1.0 - fy) * fx),
            (1, 0, fy * (1.0 - fx)),
            (1, 1, fy * fx),
        ]
        for dy, dx, wgt in corners:
            xc = x0i + dx
            yc = y0i + dy
            valid = (xc >= 0) & (xc < Wl) & (yc >= 0) & (yc < Hl)
            w = wgt * aw * valid.astype(grid.dtype)
            xcc = jnp.clip(xc, 0, Wl - 1)
            ycc = jnp.clip(yc, 0, Hl - 1)
            idx_list.append(s + ycc * Wl + xcc)
            w_list.append(w)
    idx = jnp.stack(idx_list, axis=-1).reshape(B, Lq, H, -1).astype(jnp.int32)
    w = jnp.stack(w_list, axis=-1).reshape(B, Lq, H, -1)
    return idx, w


# ----------------------------------------------------------------------------------
# BoxAttention forward
# ----------------------------------------------------------------------------------

def box_attention_forward(params, query, value, v_shapes, v_starts, v_mask,
                          v_valid_ratios, ref_windows,
                          num_head, num_level, kernel_size, sampler=None):
    B, Lq, D = query.shape
    Lv = value.shape[1]
    head_dim = D // num_head
    num_point = kernel_size ** 2

    # ---- value projection + padding mask (Pallas, bf16 out, heads packed along D) ----
    keep = (1.0 - v_mask.astype(jnp.float32)).reshape(B * Lv, 1)
    v_proj = pallas_value_proj(value.reshape(B * Lv, D),
                               params["value_w_t"], params["value_b"], keep)
    v_proj = v_proj.reshape(B, Lv, D)

    # ---- fused query projections: per-head softmax attn + box offsets (Pallas) ----
    q_flat = query.reshape(B * Lq, D)
    attn_flat, offs_flat = pallas_query_proj(
        q_flat, params["attn_w_t"], params["attn_b"],
        params["box_w_t"], params["box_b"], num_head)
    attn = attn_flat.reshape(B, Lq, num_head, num_level, num_point)
    offs = offs_flat.reshape(B, Lq, num_head, num_level, 4)

    # ---- _where_to_attend grid assembly (elementwise glue) ----
    ref = ref_windows[:, :, None, None, :]                       # (B,Lq,1,1,4)
    boxes = ref + offs / 8.0 * ref[..., jnp.array([2, 3, 2, 3])]
    center = boxes[..., None, :2]
    size = boxes[..., None, 2:]
    grid = center + params["kernel_indices"] * jax.nn.relu(size)  # (B,Lq,H,L,P,2)
    if v_valid_ratios is not None:
        grid = grid * v_valid_ratios

    # ---- BoxAttnFunction core + output projection (Pallas, lane-dense output) ----
    idx, w_comb = build_corner_weights(grid, attn, v_shapes, v_starts)   # (B,Lq,H,K)
    K = idx.shape[-1]
    idx = idx.reshape(B, Lq, num_head * K)
    w_comb = w_comb.reshape(B, Lq, num_head * K)

    if sampler is None:
        sampler = "scatter" if Lv <= _SCATTER_MAX_LV else "gather"
    if sampler == "gather":
        out = pallas_box_sample_gather(w_comb, idx, v_proj,
                                       params["out_w_t"], params["out_b"],
                                       num_head, head_dim)
    else:
        out = pallas_box_sample_scatter(w_comb, idx, v_proj,
                                        params["out_w_t"], params["out_b"],
                                        num_head, head_dim)

    attn_weights = attn.reshape(B, Lq, num_head, num_level, kernel_size, kernel_size)
    return out, attn_weights


# ----------------------------------------------------------------------------------
# Pure-JAX f32 reference (mirrors the PyTorch module) for a loose sanity check
# ----------------------------------------------------------------------------------

def reference_forward(w, query, value, v_shapes, v_starts, v_mask, v_valid_ratios,
                      ref_windows, num_head, num_level, kernel_size):
    B, Lq, D = query.shape
    Lv = value.shape[1]
    hd = D // num_head
    P = kernel_size ** 2
    G = num_level * P
    v = jnp.einsum("bld,ed->ble", value, w["value_w"]) + w["value_b"]
    v = jnp.where(v_mask[..., None], 0.0, v)
    v_heads = v.reshape(B, Lv, num_head, hd)
    logits = jnp.einsum("bqd,ed->bqe", query, w["attn_w"]) + w["attn_b"]
    attn = jax.nn.softmax(logits.reshape(B, Lq, num_head, G), axis=-1)
    attn5 = attn.reshape(B, Lq, num_head, num_level, P)
    offs = (jnp.einsum("bqd,ed->bqe", query, w["box_w"]) + w["box_b"]).reshape(
        B, Lq, num_head, num_level, 4)
    ref = ref_windows[:, :, None, None, :]
    boxes = ref + offs / 8.0 * ref[..., jnp.array([2, 3, 2, 3])]
    center, size = boxes[..., None, :2], boxes[..., None, 2:]
    grid = center + w["kernel_indices"] * jax.nn.relu(size)
    if v_valid_ratios is not None:
        grid = grid * v_valid_ratios
    idx, wc = build_corner_weights(grid, attn5, v_shapes, v_starts)      # (B,Lq,H,K)
    onehot = jax.nn.one_hot(idx, Lv, dtype=jnp.float32)                  # small shapes only
    sampled = jnp.einsum("bqhks,bqhk,bshd->bqhd", onehot, wc, v_heads).reshape(B, Lq, D)
    out = jnp.einsum("bqd,ed->bqe", sampled, w["out_w"]) + w["out_b"]
    return out, attn5.reshape(B, Lq, num_head, num_level, kernel_size, kernel_size)


# ----------------------------------------------------------------------------------
# Deterministic parameter / input construction
# ----------------------------------------------------------------------------------

def make_kernel_indices(ks):
    if ks % 2 == 0:
        idx = np.linspace(-ks // 2 + 0.5, ks // 2 - 0.5, ks)
    else:
        idx = np.linspace(-(ks - 1) // 2, (ks - 1) // 2, ks)
    i, j = np.meshgrid(idx, idx, indexing="ij")
    return jnp.asarray(np.stack([j, i], axis=-1).reshape(-1, 2) / ks, dtype=jnp.float32)


def xavier_uniform(key, shape):
    fan_out, fan_in = shape
    a = math.sqrt(6.0 / (fan_in + fan_out))
    return jax.random.uniform(key, shape, jnp.float32, -a, a)


if __name__ == "__main__":
    # small deterministic config
    D_MODEL, NUM_HEAD, NUM_LEVEL, KS = 32, 4, 2, 2
    NUM_POINT = KS * KS
    HEAD_DIM = D_MODEL // NUM_HEAD
    GROUP = NUM_LEVEL * NUM_POINT
    B, LQ = 2, 8
    V_SHAPES = ((16, 16), (8, 8))
    V_STARTS = [0, 16 * 16]
    LV = sum(h * w for h, w in V_SHAPES)

    key = jax.random.PRNGKey(0)
    k = jax.random.split(key, 10)

    value_w = xavier_uniform(k[0], (D_MODEL, D_MODEL))                  # (out, in)
    out_w = xavier_uniform(k[1], (D_MODEL, D_MODEL))
    # reference init uses zeros for these; small random keeps the path numerically non-trivial
    attn_w = 0.02 * jax.random.normal(k[2], (NUM_HEAD * NUM_LEVEL * NUM_POINT, D_MODEL))
    box_w = 0.02 * jax.random.normal(k[3], (NUM_HEAD * NUM_LEVEL * 4, D_MODEL))
    box_b = jax.random.uniform(k[4], (NUM_HEAD * NUM_LEVEL * 4,))       # uniform_ as in module
    value_b = jnp.zeros((D_MODEL,), jnp.float32)
    out_b = jnp.zeros((D_MODEL,), jnp.float32)
    attn_b = jnp.zeros((NUM_HEAD * GROUP,), jnp.float32)
    kernel_indices = make_kernel_indices(KS)

    params = {
        "value_w_t": value_w.T.astype(jnp.bfloat16),
        "value_b": value_b.reshape(1, -1),
        "out_w_t": out_w.T.astype(jnp.bfloat16),
        "out_b": out_b.reshape(1, -1),
        "attn_w_t": attn_w.T.astype(jnp.bfloat16),
        "attn_b": attn_b.reshape(1, -1),
        "box_w_t": box_w.T.astype(jnp.bfloat16),
        "box_b": box_b.reshape(1, -1),
        "kernel_indices": kernel_indices,
    }
    raw = {
        "value_w": value_w, "value_b": value_b,
        "out_w": out_w, "out_b": out_b,
        "attn_w": attn_w, "attn_b": attn_b,
        "box_w": box_w, "box_b": box_b,
        "kernel_indices": kernel_indices,
    }

    query = jax.random.normal(k[5], (B, LQ, D_MODEL), jnp.float32)
    value = jax.random.normal(k[6], (B, LV, D_MODEL), jnp.float32)
    v_mask = jnp.zeros((B, LV), dtype=bool).at[1, -8:].set(True)        # pad tail of batch 1
    # reference boxes (cx, cy, w, h) in [0, 1]
    ref_c = 0.2 + 0.6 * jax.random.uniform(k[7], (B, LQ, 2))
    ref_s = 0.1 + 0.3 * jax.random.uniform(k[8], (B, LQ, 2))
    ref_windows = jnp.concatenate([ref_c, ref_s], axis=-1)
    # per-level valid ratios, broadcastable against grid (B,Lq,H,L,P,2)
    vr = jnp.stack([jnp.full((NUM_LEVEL, 2), 1.0, jnp.float32),
                    jnp.full((NUM_LEVEL, 2), 0.9, jnp.float32)], axis=0)
    v_valid_ratios = vr[:, None, None, :, None, :]

    fwd = functools.partial(box_attention_forward,
                            num_head=NUM_HEAD, num_level=NUM_LEVEL, kernel_size=KS)

    # Default path (Lv=320 -> scatter+MXU sampler).
    out, attn_weights = fwd(params, query, value, V_SHAPES, V_STARTS, v_mask,
                            v_valid_ratios, ref_windows)
    jax.block_until_ready(out)
    jax.block_until_ready(attn_weights)

    assert out.shape == (B, LQ, D_MODEL)
    assert attn_weights.shape == (B, LQ, NUM_HEAD, NUM_LEVEL, KS, KS)
    assert bool(jnp.all(jnp.isfinite(out)))
    assert bool(jnp.all(jnp.isfinite(attn_weights)))

    # Gather-based sampler (the default at DETR-scale Lv); exercised here to prove it
    # compiles and matches.
    out_g, _ = fwd(params, query, value, V_SHAPES, V_STARTS, v_mask,
                   v_valid_ratios, ref_windows, sampler="gather")
    jax.block_until_ready(out_g)
    assert bool(jnp.all(jnp.isfinite(out_g)))

    # Loose sanity check against a pure-f32 JAX reference (kernels run bf16 MXU operands
    # with f32 accumulation, so exact equality is not expected).
    ref_out, ref_attn = reference_forward(
        raw, query, value, V_SHAPES, V_STARTS, v_mask, v_valid_ratios, ref_windows,
        NUM_HEAD, NUM_LEVEL, KS)
    assert float(jnp.max(jnp.abs(out - ref_out))) < 0.5
    assert float(jnp.max(jnp.abs(out_g - ref_out))) < 0.5
    assert float(jnp.max(jnp.abs(out - out_g))) < 0.5
    assert float(jnp.max(jnp.abs(attn_weights - ref_attn))) < 2e-2

    print("KERNEL_OK")
</pallas_src>

<mosaic_0001>
module attributes {stable_mosaic.version = 11 : i64} {
  func.func @_value_proj_kernel(%arg0: i32, %arg1: memref<640x32xf32, #tpu.memory_space<vmem>>, %arg2: memref<32x32xbf16, #tpu.memory_space<vmem>>, %arg3: memref<1x32xf32, #tpu.memory_space<vmem>>, %arg4: memref<640x1xf32, #tpu.memory_space<vmem>>, %arg5: memref<640x32xbf16, #tpu.memory_space<vmem>>) attributes {dimension_semantics = [#tpu.dimension_semantics<parallel>], iteration_bounds = array<i64: 1>, scalar_prefetch = 0 : i64, scratch_operands = 0 : i64, tpu.core_type = #tpu.core_type<tc>, window_params = [{transform_indices = @transform_0, window_bounds = array<i64: 640, 32>}, {pipeline_mode = #tpu.pipeline_mode<synchronous>, transform_indices = @transform_1, window_bounds = array<i64: 32, 32>}, {pipeline_mode = #tpu.pipeline_mode<synchronous>, transform_indices = @transform_2, window_bounds = array<i64: 1, 32>}, {transform_indices = @transform_3, window_bounds = array<i64: 640, 1>}, {transform_indices = @transform_4, window_bounds = array<i64: 640, 32>}]} {
    %c0 = arith.constant 0 : index
    %c0_0 = arith.constant 0 : index
    %0 = vector.load %arg1[%c0, %c0_0] : memref<640x32xf32, #tpu.memory_space<vmem>>, vector<640x32xf32>
    %1 = arith.truncf %0 : vector<640x32xf32> to vector<640x32xbf16>
    %c0_1 = arith.constant 0 : index
    %c0_2 = arith.constant 0 : index
    %2 = vector.load %arg2[%c0_1, %c0_2] : memref<32x32xbf16, #tpu.memory_space<vmem>>, vector<32x32xbf16>
    %cst = arith.constant dense<0.000000e+00> : vector<640x32xf32>
    %3 = tpu.matmul %1, %2, %cst {dimension_numbers = #tpu.dot_dimension_numbers<[1], [0], [0], [1], [0, 0, 1, 1], [], []>} : vector<640x32xbf16>, vector<32x32xbf16>, vector<640x32xf32> -> vector<640x32xf32>
    %c0_3 = arith.constant 0 : index
    %c0_4 = arith.constant 0 : index
    %4 = vector.load %arg3[%c0_3, %c0_4] : memref<1x32xf32, #tpu.memory_space<vmem>>, vector<1x32xf32>
    %5 = vector.broadcast %4 : vector<1x32xf32> to vector<640x32xf32>
    %6 = arith.addf %3, %5 : vector<640x32xf32>
    %c0_5 = arith.constant 0 : index
    %c0_6 = arith.constant 0 : index
    %7 = vector.load %arg4[%c0_5, %c0_6] : memref<640x1xf32, #tpu.memory_space<vmem>>, vector<640x1xf32>
    %8 = vector.broadcast %7 : vector<640x1xf32> to vector<640x32xf32>
    %9 = arith.mulf %6, %8 : vector<640x32xf32>
    %10 = arith.truncf %9 : vector<640x32xf32> to vector<640x32xbf16>
    %c0_7 = arith.constant 0 : index
    %c0_8 = arith.constant 0 : index
    %11 = vector.load %arg5[%c0_7, %c0_8] : memref<640x32xbf16, #tpu.memory_space<vmem>>, vector<640x32xbf16>
    tpu.vector_store %arg5[%c0_7, %c0_8], %10 {strides = array<i32>} : memref<640x32xbf16, #tpu.memory_space<vmem>>, vector<640x32xbf16>,
    return
  }
  func.func @transform_0(%arg0: i32) -> (i32, i32) {
    %c0_i32 = arith.constant 0 : i32
    %c0_i32_0 = arith.constant 0 : i32
    return %arg0, %c0_i32 : i32, i32
  }
  func.func @transform_1(%arg0: i32) -> (i32, i32) {
    %c0_i32 = arith.constant 0 : i32
    %c0_i32_0 = arith.constant 0 : i32
    %c0_i32_1 = arith.constant 0 : i32
    return %c0_i32, %c0_i32_0 : i32, i32
  }
  func.func @transform_2(%arg0: i32) -> (i32, i32) {
    %c0_i32 = arith.constant 0 : i32
    %c0_i32_0 = arith.constant 0 : i32
    %c0_i32_1 = arith.constant 0 : i32
    return %c0_i32, %c0_i32_0 : i32, i32
  }
  func.func @transform_3(%arg0: i32) -> (i32, i32) {
    %c0_i32 = arith.constant 0 : i32
    %c0_i32_0 = arith.constant 0 : i32
    return %arg0, %c0_i32 : i32, i32
  }
  func.func @transform_4(%arg0: i32) -> (i32, i32) {
    %c0_i32 = arith.constant 0 : i32
    %c0_i32_0 = arith.constant 0 : i32
    return %arg0, %c0_i32 : i32, i32
  }
}

</mosaic_0001>

<bundles_post_ra>
// kernel: tpu_custom_call.1
= control target key start
LH: loop header
LB: loop body
LE: loop exit
PB: predicated region body
PF: predicated region fallthrough
CT: control target
= control target key end

     0   :  { %v1938_v0 = vmov 0   ;;  %vm161_vm0 = vcmask 261120   ;;  %vm1515_vm1 = vcmask 257024   ;;  %s3015_s3 = inlined_call_operand.vmem [shape: f32[640,1], index: 3, kind: input, shape index: {}]   ;;  %s3016_s1 = inlined_call_operand.vmem [shape: bf16[32,32], index: 1, kind: input, shape index: {}]   ;;  %s3017_s0 = inlined_call_operand.vmem [shape: f32[640,32], index: 0, kind: input, shape index: {}]   ;;  %s3018_s2 = inlined_call_operand.vmem [shape: f32[1,32], index: 2, kind: input, shape index: {}]   ;;  %s3019_s4 = inlined_call_operand.vmem [shape: bf16[640,32], index: 4, kind: output, shape index: {}]  }
   0x1   :  { %1935 = vset.pattern.permute.xlu1 %v1938_v0  ;;  %1934 = vset.pattern.permute.xlu0 %v1938_v0  ;;  %v637_v1 = vld [vmem:[%s3015_s3 + $0x10] sm:$0xff]  ;;  %v635_v2 = vld [vmem:[%s3015_s3] sm:$0xff]  ;;  %v1936_v3 = vld [vmem:[%s3016_s1 + $0x8] sm:$0xff]  }
   0x2   :  { %727 = vperm.xlu1 %1935, %v637_v1   ;;  %717 = vperm.xlu0 %1934, %v635_v2   ;;  %v638_v4 = vld [vmem:[%s3015_s3 + $0x18] sm:$0xff]  ;;  %v636_v5 = vld [vmem:[%s3015_s3 + $0x8] sm:$0xff]  ;;  %v1937_v6 = vld [vmem:[%s3016_s1] sm:$0xff]  }
   0x3   :  { %1845 = vmatprep.subr.bf16.mxu0 %v1936_v3  ;;  %1929 = vmatprep.subr.bf16.mxu1 %v1936_v3  ;;  %v640_v7 = vld [vmem:[%s3015_s3 + $0x28] sm:$0xff]  ;;  %v18_v8 = vld [vmem:[%s3017_s0] sm:$0xff]  ;;  %v20_v13 = vld [vmem:[%s3017_s0 + $0x10] sm:$0xff] }
   0x4   :  { %1846 = vmatpush3.bf16.msra.mxu0 %v1936_v3  ;;  %1931 = vmatpush3.bf16.msra.mxu1 %v1936_v3  ;;  %v19_v9 = vld [vmem:[%s3017_s0 + $0x8] sm:$0xff]  ;;  %v58_v10 = vld [vmem:[%s3017_s0 + $0x140] sm:$0xff]  ;;  %v21_v14 = vld [vmem:[%s3017_s0 + $0x18] sm:$0xff] }
   0x5   :  { %v98_v11 = vpack.c.bf16 %v19_v9, %v18_v8  ;;  %v59_v12 = vld [vmem:[%s3017_s0 + $0x148] sm:$0xff]  ;;  %1847 = vmatprep.subr.bf16.mxu0 %v1937_v6  ;;  %1930 = vmatprep.subr.bf16.mxu1 %v1937_v6  ;;  %v639_v15 = vld [vmem:[%s3015_s3 + $0x20] sm:$0xff]  ;;  %v60_v17 = vld [vmem:[%s3017_s0 + $0x150] sm:$0xff]  ;;  %v99_v19 = vpack.c.bf16 %v21_v14, %v20_v13 }
   0x6   :  { %732 = vperm.xlu1 %1935, %v638_v4   ;;  %722 = vperm.xlu0 %1934, %v636_v5   ;;  %v118_v16 = vpack.c.bf16 %v59_v12, %v58_v10  ;;  %v61_v18 = vld [vmem:[%s3017_s0 + $0x158] sm:$0xff]  ;;  %v22_v21 = vld [vmem:[%s3017_s0 + $0x20] sm:$0xff]  ;;  %v23_v22 = vld [vmem:[%s3017_s0 + $0x28] sm:$0xff] }
   0x7   :  { %1849 = vmatprep.mubr.msk.bf16.mxu0 %vm161_vm0, %v98_v11  ;;  %v119_v20 = vpack.c.bf16 %v61_v18, %v60_v17  ;;  %v62_v23 = vld [vmem:[%s3017_s0 + $0x160] sm:$0xff]  ;;  %v100_v24 = vpack.c.bf16 %v23_v22, %v22_v21  ;;  %v63_v25 = vld [vmem:[%s3017_s0 + $0x168] sm:$0xff]  ;;  %v642_v26 = vld [vmem:[%s3015_s3 + $0x38] sm:$0xff] }
   0x8   :  { %1848 = vmatpush3.bf16.msra.mxu0 %v1937_v6  ;;  %1932 = vmatpush3.bf16.msra.mxu1 %v1937_v6  ;;  %v641_v27 = vld [vmem:[%s3015_s3 + $0x30] sm:$0xff]  ;;  %v120_v28 = vpack.c.bf16 %v63_v25, %v62_v23  ;;  %v25_v30 = vld [vmem:[%s3017_s0 + $0x38] sm:$0xff]  ;;  %v26_v33 = vld [vmem:[%s3017_s0 + $0x40] sm:$0xff] }
   0x9   :  { %1889 = vmatprep.mubr.msk.bf16.mxu1 %vm161_vm0, %v118_v16  ;;  %v24_v29 = vld [vmem:[%s3017_s0 + $0x30] sm:$0xff]  ;;  %v65_v32 = vld [vmem:[%s3017_s0 + $0x178] sm:$0xff]  ;;  %v27_v34 = vld [vmem:[%s3017_s0 + $0x48] sm:$0xff] }
   0xa   :  { %742 = vperm.xlu1 %1935, %v640_v7   ;;  %737 = vperm.xlu0 %1934, %v639_v15   ;;  %v64_v31 = vld [vmem:[%s3017_s0 + $0x170] sm:$0xff]  ;;  %v66_v35 = vld [vmem:[%s3017_s0 + $0x180] sm:$0xff]  ;;  %v67_v36 = vld [vmem:[%s3017_s0 + $0x188] sm:$0xff]  ;;  %v101_v39 = vpack.c.bf16 %v25_v30, %v24_v29  ;;  %v102_v41 = vpack.c.bf16 %v27_v34, %v26_v33 }
   0xb   :  { %1850 = vmatmul.mubr.msk.bf16.vlgmr.msra.gmra.mxu0 %vm161_vm0, %v99_v19  ;;  %1890 = vmatmul.mubr.msk.bf16.vlgmr.msra.gmra.mxu1 %vm161_vm0, %v119_v20  ;;  %v644_v37 = vld [vmem:[%s3015_s3 + $0x48] sm:$0xff]  ;;  %v643_v38 = vld [vmem:[%s3015_s3 + $0x40] sm:$0xff]  ;;  %v121_v40 = vpack.c.bf16 %v65_v32, %v64_v31  ;;  %v122_v42 = vpack.c.bf16 %v67_v36, %v66_v35  ;;  %v646_v43 = vld [vmem:[%s3015_s3 + $0x58] sm:$0xff] }
   0xc   :  { %1853 = vmatprep.mubr.msk.bf16.mxu0 %vm161_vm0, %v100_v24  ;;  %1893 = vmatprep.mubr.msk.bf16.mxu1 %vm161_vm0, %v120_v28  ;;  %v645_v44 = vld [vmem:[%s3015_s3 + $0x50] sm:$0xff]  ;;  %v29_v46 = vld [vmem:[%s3017_s0 + $0x58] sm:$0xff]  ;;  %v30_v49 = vld [vmem:[%s3017_s0 + $0x60] sm:$0xff] }
   0xd   :  { %v28_v45 = vld [vmem:[%s3017_s0 + $0x50] sm:$0xff]  ;;  %v69_v48 = vld [vmem:[%s3017_s0 + $0x198] sm:$0xff]  ;;  %v31_v50 = vld [vmem:[%s3017_s0 + $0x68] sm:$0xff] }
   0xe   :  { %752 = vperm.xlu1 %1935, %v642_v26   ;;  %747 = vperm.xlu0 %1934, %v641_v27   ;;  %v68_v47 = vld [vmem:[%s3017_s0 + $0x190] sm:$0xff]  ;;  %v70_v51 = vld [vmem:[%s3017_s0 + $0x1a0] sm:$0xff]  ;;  %v71_v52 = vld [vmem:[%s3017_s0 + $0x1a8] sm:$0xff]  ;;  %v103_v55 = vpack.c.bf16 %v29_v46, %v28_v45  ;;  %v104_v57 = vpack.c.bf16 %v31_v50, %v30_v49 }
   0xf   :  { %v648_v53 = vld [vmem:[%s3015_s3 + $0x68] sm:$0xff]  ;;  %v647_v54 = vld [vmem:[%s3015_s3 + $0x60] sm:$0xff]  ;;  %v123_v56 = vpack.c.bf16 %v69_v48, %v68_v47  ;;  %v124_v58 = vpack.c.bf16 %v71_v52, %v70_v51  ;;  %v650_v59 = vld [vmem:[%s3015_s3 + $0x78] sm:$0xff] }
  0x10   :  { %v649_v60 = vld [vmem:[%s3015_s3 + $0x70] sm:$0xff]  ;;  %v33_v62 = vld [vmem:[%s3017_s0 + $0x78] sm:$0xff]  ;;  %v34_v1 = vld [vmem:[%s3017_s0 + $0x80] sm:$0xff] }
  0x11   :  { %v32_v61 = vld [vmem:[%s3017_s0 + $0x70] sm:$0xff]  ;;  %v73_v0 = vld [vmem:[%s3017_s0 + $0x1b8] sm:$0xff]  ;;  %v35_v2 = vld [vmem:[%s3017_s0 + $0x88] sm:$0xff] }
  0x12   :  { %762 = vperm.xlu1 %1935, %v644_v37   ;;  %757 = vperm.xlu0 %1934, %v643_v38   ;;  %v72_v63 = vld [vmem:[%s3017_s0 + $0x1b0] sm:$0xff]  ;;  %v74_v3 = vld [vmem:[%s3017_s0 + $0x1c0] sm:$0xff]  ;;  %v75_v4 = vld [vmem:[%s3017_s0 + $0x1c8] sm:$0xff]  ;;  %v105_v7 = vpack.c.bf16 %v33_v62, %v32_v61  ;;  %v106_v9 = vpack.c.bf16 %v35_v2, %v34_v1 }
  0x13   :  { %1854 = vmatmul.mubr.msk.bf16.gmra.mxu0 %vm161_vm0, %v101_v39  ;;  %1894 = vmatmul.mubr.msk.bf16.gmra.mxu1 %vm161_vm0, %v121_v40  ;;  %v652_v5 = vld [vmem:[%s3015_s3 + $0x88] sm:$0xff]  ;;  %v651_v6 = vld [vmem:[%s3015_s3 + $0x80] sm:$0xff]  ;;  %v125_v8 = vpack.c.bf16 %v73_v0, %v72_v63  ;;  %v126_v10 = vpack.c.bf16 %v75_v4, %v74_v3  ;;  %v654_v11 = vld [vmem:[%s3015_s3 + $0x98] sm:$0xff] }
  0x14   :  { %1857 = vmatprep.mubr.msk.bf16.mxu0 %vm161_vm0, %v102_v41  ;;  %1897 = vmatprep.mubr.msk.bf16.mxu1 %vm161_vm0, %v122_v42  ;;  %v653_v12 = vld [vmem:[%s3015_s3 + $0x90] sm:$0xff]  ;;  %v37_v14 = vld [vmem:[%s3017_s0 + $0x98] sm:$0xff]  ;;  %v38_v17 = vld [vmem:[%s3017_s0 + $0xa0] sm:$0xff] }
  0x15   :  { %v36_v13 = vld [vmem:[%s3017_s0 + $0x90] sm:$0xff]  ;;  %v77_v16 = vld [vmem:[%s3017_s0 + $0x1d8] sm:$0xff]  ;;  %v39_v18 = vld [vmem:[%s3017_s0 + $0xa8] sm:$0xff] }
  0x16   :  { %772 = vperm.xlu1 %1935, %v646_v43   ;;  %767 = vperm.xlu0 %1934, %v645_v44   ;;  %v76_v15 = vld [vmem:[%s3017_s0 + $0x1d0] sm:$0xff]  ;;  %v78_v19 = vld [vmem:[%s3017_s0 + $0x1e0] sm:$0xff]  ;;  %v79_v20 = vld [vmem:[%s3017_s0 + $0x1e8] sm:$0xff]  ;;  %v107_v23 = vpack.c.bf16 %v37_v14, %v36_v13  ;;  %v108_v25 = vpack.c.bf16 %v39_v18, %v38_v17 }
  0x17   :  { %v656_v21 = vld [vmem:[%s3015_s3 + $0xa8] sm:$0xff]  ;;  %v655_v22 = vld [vmem:[%s3015_s3 + $0xa0] sm:$0xff]  ;;  %v127_v24 = vpack.c.bf16 %v77_v16, %v76_v15  ;;  %v128_v26 = vpack.c.bf16 %v79_v20, %v78_v19  ;;  %v658_v27 = vld [vmem:[%s3015_s3 + $0xb8] sm:$0xff] }
  0x18   :  { %v657_v28 = vld [vmem:[%s3015_s3 + $0xb0] sm:$0xff]  ;;  %v41_v30 = vld [vmem:[%s3017_s0 + $0xb8] sm:$0xff]  ;;  %v42_v33 = vld [vmem:[%s3017_s0 + $0xc0] sm:$0xff] }
  0x19   :  { %v40_v29 = vld [vmem:[%s3017_s0 + $0xb0] sm:$0xff]  ;;  %v81_v32 = vld [vmem:[%s3017_s0 + $0x1f8] sm:$0xff]  ;;  %v43_v34 = vld [vmem:[%s3017_s0 + $0xc8] sm:$0xff] }
  0x1a   :  { %782 = vperm.xlu1 %1935, %v648_v53   ;;  %777 = vperm.xlu0 %1934, %v647_v54   ;;  %v80_v31 = vld [vmem:[%s3017_s0 + $0x1f0] sm:$0xff]  ;;  %v82_v35 = vld [vmem:[%s3017_s0 + $0x200] sm:$0xff]  ;;  %v83_v36 = vld [vmem:[%s3017_s0 + $0x208] sm:$0xff]  ;;  %v109_v39 = vpack.c.bf16 %v41_v30, %v40_v29  ;;  %v110_v41 = vpack.c.bf16 %v43_v34, %v42_v33 }
  0x1b   :  { %1858 = vmatmul.mubr.msk.bf16.gmra.mxu0 %vm161_vm0, %v103_v55  ;;  %1898 = vmatmul.mubr.msk.bf16.gmra.mxu1 %vm161_vm0, %v123_v56  ;;  %v660_v37 = vld [vmem:[%s3015_s3 + $0xc8] sm:$0xff]  ;;  %v659_v38 = vld [vmem:[%s3015_s3 + $0xc0] sm:$0xff]  ;;  %v129_v40 = vpack.c.bf16 %v81_v32, %v80_v31  ;;  %v130_v42 = vpack.c.bf16 %v83_v36, %v82_v35  ;;  %v662_v43 = vld [vmem:[%s3015_s3 + $0xd8] sm:$0xff] }
  0x1c   :  { %1861 = vmatprep.mubr.msk.bf16.mxu0 %vm161_vm0, %v104_v57  ;;  %1901 = vmatprep.mubr.msk.bf16.mxu1 %vm161_vm0, %v124_v58  ;;  %v661_v44 = vld [vmem:[%s3015_s3 + $0xd0] sm:$0xff]  ;;  %v45_v46 = vld [vmem:[%s3017_s0 + $0xd8] sm:$0xff]  ;;  %v46_v49 = vld [vmem:[%s3017_s0 + $0xe0] sm:$0xff] }
  0x1d   :  { %v44_v45 = vld [vmem:[%s3017_s0 + $0xd0] sm:$0xff]  ;;  %v85_v48 = vld [vmem:[%s3017_s0 + $0x218] sm:$0xff]  ;;  %v47_v50 = vld [vmem:[%s3017_s0 + $0xe8] sm:$0xff] }
  0x1e   :  { %792 = vperm.xlu1 %1935, %v650_v59   ;;  %787 = vperm.xlu0 %1934, %v649_v60   ;;  %v84_v47 = vld [vmem:[%s3017_s0 + $0x210] sm:$0xff]  ;;  %v86_v51 = vld [vmem:[%s3017_s0 + $0x220] sm:$0xff]  ;;  %v87_v52 = vld [vmem:[%s3017_s0 + $0x228] sm:$0xff]  ;;  %v111_v55 = vpack.c.bf16 %v45_v46, %v44_v45  ;;  %v112_v57 = vpack.c.bf16 %v47_v50, %v46_v49 }
  0x1f   :  { %v664_v53 = vld [vmem:[%s3015_s3 + $0xe8] sm:$0xff]  ;;  %v663_v54 = vld [vmem:[%s3015_s3 + $0xe0] sm:$0xff]  ;;  %v131_v56 = vpack.c.bf16 %v85_v48, %v84_v47  ;;  %v132_v58 = vpack.c.bf16 %v87_v52, %v86_v51  ;;  %v666_v59 = vld [vmem:[%s3015_s3 + $0xf8] sm:$0xff] }
  0x20   :  { %v665_v60 = vld [vmem:[%s3015_s3 + $0xf0] sm:$0xff]  ;;  %v49_v62 = vld [vmem:[%s3017_s0 + $0xf8] sm:$0xff]  ;;  %v50_v1 = vld [vmem:[%s3017_s0 + $0x100] sm:$0xff] }
  0x21   :  { %v48_v61 = vld [vmem:[%s3017_s0 + $0xf0] sm:$0xff]  ;;  %v89_v0 = vld [vmem:[%s3017_s0 + $0x238] sm:$0xff]  ;;  %v51_v2 = vld [vmem:[%s3017_s0 + $0x108] sm:$0xff] }
  0x22   :  { %802 = vperm.xlu1 %1935, %v652_v5   ;;  %797 = vperm.xlu0 %1934, %v651_v6   ;;  %v88_v63 = vld [vmem:[%s3017_s0 + $0x230] sm:$0xff]  ;;  %v90_v3 = vld [vmem:[%s3017_s0 + $0x240] sm:$0xff]  ;;  %v91_v4 = vld [vmem:[%s3017_s0 + $0x248] sm:$0xff] }
  0x23   :  { %1862 = vmatmul.mubr.msk.bf16.gmra.mxu0 %vm161_vm0, %v105_v7  ;;  %1902 = vmatmul.mubr.msk.bf16.gmra.mxu1 %vm161_vm0, %v125_v8  ;;  %v668_v5 = vld [vmem:[%s3015_s3 + $0x108] sm:$0xff]  ;;  %v667_v6 = vld [vmem:[%s3015_s3 + $0x100] sm:$0xff]  ;;  %v113_v7 = vpack.c.bf16 %v49_v62, %v48_v61  ;;  %v133_v8 = vpack.c.bf16 %v89_v0, %v88_v63  ;;  %v52_v13 = vld [vmem:[%s3017_s0 + $0x110] sm:$0xff] }
  0x24   :  { %1865 = vmatprep.mubr.msk.bf16.mxu0 %vm161_vm0, %v106_v9  ;;  %1905 = vmatprep.mubr.msk.bf16.mxu1 %vm161_vm0, %v126_v10  ;;  %v114_v9 = vpack.c.bf16 %v51_v2, %v50_v1  ;;  %v134_v10 = vpack.c.bf16 %v91_v4, %v90_v3  ;;  %v53_v14 = vld [vmem:[%s3017_s0 + $0x118] sm:$0xff]  ;;  %v92_v15 = vld [vmem:[%s3017_s0 + $0x250] sm:$0xff]  ;;  %v54_v17 = vld [vmem:[%s3017_s0 + $0x120] sm:$0xff] }
  0x25   :  { %v93_v16 = vld [vmem:[%s3017_s0 + $0x258] sm:$0xff]  ;;  %v55_v18 = vld [vmem:[%s3017_s0 + $0x128] sm:$0xff]  ;;  %v94_v19 = vld [vmem:[%s3017_s0 + $0x260] sm:$0xff] }
  0x26   :  { %812 = vperm.xlu1 %1935, %v654_v11   ;;  %807 = vperm.xlu0 %1934, %v653_v12   ;;  %v670_v11 = vld [vmem:[%s3015_s3 + $0x118] sm:$0xff]  ;;  %v669_v12 = vld [vmem:[%s3015_s3 + $0x110] sm:$0xff]  ;;  %v95_v20 = vld [vmem:[%s3017_s0 + $0x268] sm:$0xff] }
  0x27   :  { %v56_v29 = vld [vmem:[%s3017_s0 + $0x130] sm:$0xff]  ;;  %v57_v30 = vld [vmem:[%s3017_s0 + $0x138] sm:$0xff]  ;;  %v676_v33 = vld [vmem:[%s3015_s3 + $0x148] sm:$0xff] }
  0x28   :  { %v96_v31 = vld [vmem:[%s3017_s0 + $0x270] sm:$0xff]  ;;  %v97_v32 = vld [vmem:[%s3017_s0 + $0x278] sm:$0xff]  ;;  %v675_v34 = vld [vmem:[%s3015_s3 + $0x140] sm:$0xff]  ;;  %v117_v35 = vpack.c.bf16 %v57_v30, %v56_v29 }
  0x29   :  { %v137_v36 = vpack.c.bf16 %v97_v32, %v96_v31  ;;  %v686_v45 = vld [vmem:[%s3015_s3 + $0x198] sm:$0xff]  ;;  %v685_v46 = vld [vmem:[%s3015_s3 + $0x190] sm:$0xff]  ;;  %v688_v47 = vld [vmem:[%s3015_s3 + $0x1a8] sm:$0xff] }
  0x2a   :  { %822 = vperm.xlu1 %1935, %v656_v21   ;;  %817 = vperm.xlu0 %1934, %v655_v22   ;;  %v672_v21 = vld [vmem:[%s3015_s3 + $0x128] sm:$0xff]  ;;  %v671_v22 = vld [vmem:[%s3015_s3 + $0x120] sm:$0xff]  ;;  %v690_v49 = vld [vmem:[%s3015_s3 + $0x1b8] sm:$0xff] }
  0x2b   :  { %1866 = vmatmul.mubr.msk.bf16.gmra.mxu0 %vm161_vm0, %v107_v23  ;;  %1906 = vmatmul.mubr.msk.bf16.gmra.mxu1 %vm161_vm0, %v127_v24  ;;  %v115_v23 = vpack.c.bf16 %v53_v14, %v52_v13  ;;  %v135_v24 = vpack.c.bf16 %v93_v16, %v92_v15  ;;  %v687_v48 = vld [vmem:[%s3015_s3 + $0x1a0] sm:$0xff]  ;;  %v689_v50 = vld [vmem:[%s3015_s3 + $0x1b0] sm:$0xff]  ;;  %v692_v51 = vld [vmem:[%s3015_s3 + $0x1c8] sm:$0xff] }
  0x2c   :  { %1869 = vmatprep.mubr.msk.bf16.mxu0 %vm161_vm0, %v108_v25  ;;  %1909 = vmatprep.mubr.msk.bf16.mxu1 %vm161_vm0, %v128_v26  ;;  %v116_v25 = vpack.c.bf16 %v55_v18, %v54_v17  ;;  %v136_v26 = vpack.c.bf16 %v95_v20, %v94_v19  ;;  %v691_v52 = vld [vmem:[%s3015_s3 + $0x1c0] sm:$0xff]  ;;  %v700_v61 = vld [vmem:[%s3015_s3 + $0x208] sm:$0xff]  ;;  %v702_v1 = vld [vmem:[%s3015_s3 + $0x218] sm:$0xff] }
  0x2d   :  { %v699_v62 = vld [vmem:[%s3015_s3 + $0x200] sm:$0xff]  ;;  %v701_v2 = vld [vmem:[%s3015_s3 + $0x210] sm:$0xff]  ;;  %v708_v13 = vld [vmem:[%s3015_s3 + $0x248] sm:$0xff] }
  0x2e   :  { %832 = vperm.xlu1 %1935, %v658_v27   ;;  %827 = vperm.xlu0 %1934, %v657_v28   ;;  %v674_v27 = vld [vmem:[%s3015_s3 + $0x138] sm:$0xff]  ;;  %v673_v28 = vld [vmem:[%s3015_s3 + $0x130] sm:$0xff]  ;;  %v707_v14 = vld [vmem:[%s3015_s3 + $0x240] sm:$0xff] }
  0x2f   :  { %v710_v17 = vld [vmem:[%s3015_s3 + $0x258] sm:$0xff]  ;;  %v709_v18 = vld [vmem:[%s3015_s3 + $0x250] sm:$0xff] }
  0x32   :  { %842 = vperm.xlu1 %1935, %v660_v37   ;;  %837 = vperm.xlu0 %1934, %v659_v38   ;;  %v678_v37 = vld [vmem:[%s3015_s3 + $0x158] sm:$0xff]  ;;  %v677_v38 = vld [vmem:[%s3015_s3 + $0x150] sm:$0xff] }
  0x33   :  { %1870 = vmatmul.mubr.msk.bf16.gmra.mxu0 %vm161_vm0, %v109_v39  ;;  %1910 = vmatmul.mubr.msk.bf16.gmra.mxu1 %vm161_vm0, %v129_v40  ;;  %v680_v39 = vld [vmem:[%s3015_s3 + $0x168] sm:$0xff]  ;;  %v679_v40 = vld [vmem:[%s3015_s3 + $0x160] sm:$0xff] }
  0x34   :  { %1873 = vmatprep.mubr.msk.bf16.mxu0 %vm161_vm0, %v110_v41  ;;  %1913 = vmatprep.mubr.msk.bf16.mxu1 %vm161_vm0, %v130_v42  ;;  %v682_v41 = vld [vmem:[%s3015_s3 + $0x178] sm:$0xff]  ;;  %v681_v42 = vld [vmem:[%s3015_s3 + $0x170] sm:$0xff] }
  0x36   :  { %852 = vperm.xlu1 %1935, %v662_v43   ;;  %847 = vperm.xlu0 %1934, %v661_v44   ;;  %v684_v43 = vld [vmem:[%s3015_s3 + $0x188] sm:$0xff]  ;;  %v683_v44 = vld [vmem:[%s3015_s3 + $0x180] sm:$0xff] }
  0x3a   :  { %862 = vperm.xlu1 %1935, %v664_v53   ;;  %857 = vperm.xlu0 %1934, %v663_v54   ;;  %v694_v53 = vld [vmem:[%s3015_s3 + $0x1d8] sm:$0xff]  ;;  %v693_v54 = vld [vmem:[%s3015_s3 + $0x1d0] sm:$0xff] }
  0x3b   :  { %1874 = vmatmul.mubr.msk.bf16.gmra.mxu0 %vm161_vm0, %v111_v55  ;;  %1914 = vmatmul.mubr.msk.bf16.gmra.mxu1 %vm161_vm0, %v131_v56  ;;  %v696_v55 = vld [vmem:[%s3015_s3 + $0x1e8] sm:$0xff]  ;;  %v695_v56 = vld [vmem:[%s3015_s3 + $0x1e0] sm:$0xff] }
  0x3c   :  { %1877 = vmatprep.mubr.msk.bf16.mxu0 %vm161_vm0, %v112_v57  ;;  %1917 = vmatprep.mubr.msk.bf16.mxu1 %vm161_vm0, %v132_v58  ;;  %v698_v57 = vld [vmem:[%s3015_s3 + $0x1f8] sm:$0xff]  ;;  %v697_v58 = vld [vmem:[%s3015_s3 + $0x1f0] sm:$0xff] }
  0x3e   :  { %872 = vperm.xlu1 %1935, %v666_v59   ;;  %867 = vperm.xlu0 %1934, %v665_v60  }
  0x42   :  { %882 = vperm.xlu1 %1935, %v668_v5   ;;  %877 = vperm.xlu0 %1934, %v667_v6   ;;  %v704_v5 = vld [vmem:[%s3015_s3 + $0x228] sm:$0xff]  ;;  %v703_v6 = vld [vmem:[%s3015_s3 + $0x220] sm:$0xff] }
  0x43   :  { %1878 = vmatmul.mubr.msk.bf16.gmra.mxu0 %vm161_vm0, %v113_v7  ;;  %1918 = vmatmul.mubr.msk.bf16.gmra.mxu1 %vm161_vm0, %v133_v8 }
  0x44   :  { %1881 = vmatprep.mubr.msk.bf16.mxu0 %vm161_vm0, %v114_v9  ;;  %1921 = vmatprep.mubr.msk.bf16.mxu1 %vm161_vm0, %v134_v10  ;;  %v706_v9 = vld [vmem:[%s3015_s3 + $0x238] sm:$0xff]  ;;  %v705_v10 = vld [vmem:[%s3015_s3 + $0x230] sm:$0xff] }
  0x46   :  { %892 = vperm.xlu1 %1935, %v670_v11   ;;  %887 = vperm.xlu0 %1934, %v669_v12  }
  0x4a   :  { %902 = vperm.xlu1 %1935, %v672_v21   ;;  %897 = vperm.xlu0 %1934, %v671_v22   ;;  %v712_v21 = vld [vmem:[%s3015_s3 + $0x268] sm:$0xff]  ;;  %v711_v22 = vld [vmem:[%s3015_s3 + $0x260] sm:$0xff] }
  0x4b   :  { %1882 = vmatmul.mubr.msk.bf16.gmra.mxu0 %vm161_vm0, %v115_v23  ;;  %1922 = vmatmul.mubr.msk.bf16.gmra.mxu1 %vm161_vm0, %v135_v24 }
  0x4c   :  { %1885 = vmatprep.mubr.msk.bf16.mxu0 %vm161_vm0, %v116_v25  ;;  %1925 = vmatprep.mubr.msk.bf16.mxu1 %vm161_vm0, %v136_v26  ;;  %v714_v25 = vld [vmem:[%s3015_s3 + $0x278] sm:$0xff]  ;;  %v713_v26 = vld [vmem:[%s3015_s3 + $0x270] sm:$0xff] }
  0x4e   :  { %912 = vperm.xlu1 %1935, %v674_v27   ;;  %907 = vperm.xlu0 %1934, %v673_v28  }
  0x52   :  { %922 = vperm.xlu1 %1935, %v676_v33   ;;  %917 = vperm.xlu0 %1934, %v675_v34  }
  0x53   :  { %1886 = vmatmul.mubr.msk.bf16.gmra.mxu0 %vm161_vm0, %v117_v35  ;;  %1926 = vmatmul.mubr.msk.bf16.gmra.mxu1 %vm161_vm0, %v137_v36 }
  0x56   :  { %932 = vperm.xlu1 %1935, %v678_v37   ;;  %927 = vperm.xlu0 %1934, %v677_v38  }
  0x5a   :  { %942 = vperm.xlu1 %1935, %v680_v39   ;;  %937 = vperm.xlu0 %1934, %v679_v40  }
  0x5e   :  { %952 = vperm.xlu1 %1935, %v682_v41   ;;  %947 = vperm.xlu0 %1934, %v681_v42  }
  0x62   :  { %962 = vperm.xlu1 %1935, %v684_v43   ;;  %957 = vperm.xlu0 %1934, %v683_v44  }
  0x66   :  { %972 = vperm.xlu1 %1935, %v686_v45   ;;  %967 = vperm.xlu0 %1934, %v685_v46  }
  0x6a   :  { %982 = vperm.xlu1 %1935, %v688_v47   ;;  %977 = vperm.xlu0 %1934, %v687_v48  }
  0x6e   :  { %992 = vperm.xlu1 %1935, %v690_v49   ;;  %987 = vperm.xlu0 %1934, %v689_v50  }
  0x72   :  { %1002 = vperm.xlu1 %1935, %v692_v51   ;;  %997 = vperm.xlu0 %1934, %v691_v52   ;;  %v2573_v51 = vld [vmem:[%s3018_s2] ss:$0 sm:$0xff] }
  0x76   :  { %1012 = vperm.xlu1 %1935, %v694_v53   ;;  %1007 = vperm.xlu0 %1934, %v693_v54  }
  0x7a   :  { %1022 = vperm.xlu1 %1935, %v696_v55   ;;  %1017 = vperm.xlu0 %1934, %v695_v56  }
  0x7d   :  { %v2442_v59 = vpop.permute.xlu1 %727  ;;  %v2444_v60 = vpop.permute.xlu0 %717 }
  0x7e   :  { %1032 = vperm.xlu1 %1935, %v698_v57   ;;  %1027 = vperm.xlu0 %1934, %v697_v58  }
  0x81   :  { %v2452_v63 = vpop.permute.xlu1 %732  ;;  %v2454_v0 = vpop.permute.xlu0 %722 }
  0x82   :  { %1042 = vperm.xlu1 %1935, %v700_v61   ;;  %1037 = vperm.xlu0 %1934, %v699_v62  }
  0x85   :  { %v2462_v3 = vpop.permute.xlu1 %742  ;;  %v2464_v4 = vpop.permute.xlu0 %737 }
  0x86   :  { %1052 = vperm.xlu1 %1935, %v702_v1   ;;  %1047 = vperm.xlu0 %1934, %v701_v2  }
  0x89   :  { %v2472_v7 = vpop.permute.xlu1 %752  ;;  %v2474_v8 = vpop.permute.xlu0 %747 }
  0x8a   :  { %1062 = vperm.xlu1 %1935, %v704_v5   ;;  %1057 = vperm.xlu0 %1934, %v703_v6  }
  0x8d   :  { %v2482_v11 = vpop.permute.xlu1 %762  ;;  %v2484_v12 = vpop.permute.xlu0 %757 }
  0x8e   :  { %1072 = vperm.xlu1 %1935, %v706_v9   ;;  %1067 = vperm.xlu0 %1934, %v705_v10  }
  0x91   :  { %v2492_v15 = vpop.permute.xlu1 %772  ;;  %v2494_v16 = vpop.permute.xlu0 %767 }
  0x92   :  { %1082 = vperm.xlu1 %1935, %v708_v13   ;;  %1077 = vperm.xlu0 %1934, %v707_v14  }
  0x95   :  { %v2502_v19 = vpop.permute.xlu1 %782  ;;  %v2504_v20 = vpop.permute.xlu0 %777 }
  0x96   :  { %1092 = vperm.xlu1 %1935, %v710_v17   ;;  %1087 = vperm.xlu0 %1934, %v709_v18  }
  0x99   :  { %v2512_v23 = vpop.permute.xlu1 %792  ;;  %v2514_v24 = vpop.permute.xlu0 %787 }
  0x9a   :  { %1102 = vperm.xlu1 %1935, %v712_v21   ;;  %1097 = vperm.xlu0 %1934, %v711_v22  }
  0x9d   :  { %v2522_v27 = vpop.permute.xlu1 %802  ;;  %v2524_v28 = vpop.permute.xlu0 %797 }
  0x9e   :  { %1112 = vperm.xlu1 %1935, %v714_v25   ;;  %1107 = vperm.xlu0 %1934, %v713_v26  }
  0xa1   :  { %v2526_v29 = vpop.permute.xlu1 %812  ;;  %v2528_v30 = vpop.permute.xlu0 %807 }
  0xa5   :  { %v2530_v31 = vpop.permute.xlu1 %822  ;;  %v2532_v32 = vpop.permute.xlu0 %817 }
  0xa9   :  { %v2534_v33 = vpop.permute.xlu1 %832  ;;  %v2536_v34 = vpop.permute.xlu0 %827 }
  0xad   :  { %v2538_v35 = vpop.permute.xlu1 %842  ;;  %v2540_v36 = vpop.permute.xlu0 %837 }
  0xb1   :  { %v2542_v37 = vpop.permute.xlu1 %852  ;;  %v2544_v38 = vpop.permute.xlu0 %847 }
  0xb5   :  { %v2546_v39 = vpop.permute.xlu1 %862  ;;  %v2548_v40 = vpop.permute.xlu0 %857 }
  0xb9   :  { %v2550_v41 = vpop.permute.xlu1 %872  ;;  %v2552_v42 = vpop.permute.xlu0 %867 }
  0xbd   :  { %v2554_v43 = vpop.permute.xlu1 %882  ;;  %v2556_v44 = vpop.permute.xlu0 %877 }
  0xc1   :  { %v2558_v45 = vpop.permute.xlu1 %892  ;;  %v2560_v46 = vpop.permute.xlu0 %887 }
  0xc5   :  { %v2562_v47 = vpop.permute.xlu1 %902  ;;  %v2564_v48 = vpop.permute.xlu0 %897 }
  0xc9   :  { %v2566_v49 = vpop.permute.xlu1 %912  ;;  %v2568_v50 = vpop.permute.xlu0 %907 }
  0xcb   :  { %v1851_v52 = vpop.f32.mrf.mxu0  ;;  %v1891_v53 = vpop.f32.mrf.mxu1 }
  0xcc   :  { %v325_v54 = vadd.f32 %v1851_v52, %v2573_v51  ;;  %v485_v2 = vadd.f32 %v1891_v53, %v2573_v51 }
  0xcd   :  { %v923_v55 = vpop.permute.xlu1 %922  ;;  %v918_v56 = vpop.permute.xlu0 %917 }
  0xce   :  { %v316_v57 = vpop.f32.mrf.mxu0  ;;  %v476_v58 = vpop.f32.mrf.mxu1  ;;  %v1117_v61 = vmul.f32 %v2442_v59, %v325_v54 }
  0xcf   :  { %v317_v62 = vadd.f32 %v2573_v51, %v316_v57  ;;  %v477_v1 = vadd.f32 %v2573_v51, %v476_v58 }
  0xd0   :  { %v1852_v5 = vpop.f32.mrf.mxu0  ;;  %v1892_v6 = vpop.f32.mrf.mxu1  ;;  %v1725_v9 = vpack.c.bf16 %v1117_v61, %v1117_v61 }
  0xd1   :  { %v1115_v10 = vmul.f32 %v2444_v60, %v317_v62  ;;  %v1155_v13 = vmul.f32 %v918_v56, %v477_v1  ;;  %v328_v14 = vadd.f32 %v1852_v5, %v2573_v51  ;;  %v933_v17 = vpop.permute.xlu1 %932  ;;  %v928_v18 = vpop.permute.xlu0 %927  ;;  %v488_v21 = vadd.f32 %v1892_v6, %v2573_v51 }
  0xd2   :  { %v1157_v59 = vmul.f32 %v928_v18, %v485_v2  ;;  %v319_v22 = vpop.f32.mrf.mxu0  ;;  %v479_v25 = vpop.f32.mrf.mxu1  ;;  %1518 = vst.msk [vmem:[%s3019_s4 + $0x8] sm:$0xf] %vm1515_vm1, %v1725_v9 }
  0xd3   :  { %v1723_v26 = vpack.c.bf16 %v1115_v10, %v1115_v10  ;;  %v1763_v52 = vpack.c.bf16 %v1155_v13, %v1155_v13  ;;  %v1118_v53 = vmul.f32 %v2452_v63, %v328_v14  ;;  %v320_v60 = vadd.f32 %v2573_v51, %v319_v22 }
  0xd4   :  { %v1158_v54 = vmul.f32 %v933_v17, %v488_v21  ;;  %v1765_v56 = vpack.c.bf16 %v1157_v59, %v1157_v59  ;;  %v480_v57 = vadd.f32 %v2573_v51, %v479_v25  ;;  %v1855_v58 = vpop.f32.mrf.mxu0  ;;  %v1895_v61 = vpop.f32.mrf.mxu1 }
  0xd5   :  { %1516 = vst.msk [vmem:[%s3019_s4] sm:$0xf] %vm1515_vm1, %v1723_v26  ;;  %1556 = vst.msk [vmem:[%s3019_s4 + $0xa0] sm:$0xf] %vm1515_vm1, %v1763_v52  ;;  %v1726_v62 = vpack.c.bf16 %v1118_v53, %v1118_v53  ;;  %v1116_v63 = vmul.f32 %v2454_v0, %v320_v60  ;;  %v341_v1 = vadd.f32 %v1855_v58, %v2573_v51  ;;  %v943_v2 = vpop.permute.xlu1 %942  ;;  %v938_v5 = vpop.permute.xlu0 %937 }
  0xd6   :  { %v1766_v6 = vpack.c.bf16 %v1158_v54, %v1158_v54  ;;  %1558 = vst.msk [vmem:[%s3019_s4 + $0xa8] sm:$0xf] %vm1515_vm1, %v1765_v56  ;;  %v1156_v9 = vmul.f32 %v923_v55, %v480_v57  ;;  %v332_v10 = vpop.f32.mrf.mxu0  ;;  %v492_v13 = vpop.f32.mrf.mxu1  ;;  %v501_v21 = vadd.f32 %v1895_v61, %v2573_v51 }
  0xd7   :  { %1519 = vst.msk [vmem:[%s3019_s4 + $0xc] sm:$0xf] %vm1515_vm1, %v1726_v62  ;;  %v1724_v14 = vpack.c.bf16 %v1116_v63, %v1116_v63  ;;  %v1121_v0 = vmul.f32 %v2474_v8, %v341_v1  ;;  %v333_v17 = vadd.f32 %v2573_v51, %v332_v10  ;;  %v493_v18 = vadd.f32 %v2573_v51, %v492_v13 }
  0xd8   :  { %1559 = vst.msk [vmem:[%s3019_s4 + $0xac] sm:$0xf] %vm1515_vm1, %v1766_v6  ;;  %v1764_v55 = vpack.c.bf16 %v1156_v9, %v1156_v9  ;;  %v1856_v59 = vpop.f32.mrf.mxu0  ;;  %v1896_v22 = vpop.f32.mrf.mxu1 }
  0xd9   :  { %1517 = vst.msk [vmem:[%s3019_s4 + $0x4] sm:$0xf] %vm1515_vm1, %v1724_v14  ;;  %v1729_v8 = vpack.c.bf16 %v1121_v0, %v1121_v0  ;;  %v1119_v25 = vmul.f32 %v2464_v4, %v333_v17  ;;  %v1159_v26 = vmul.f32 %v938_v5, %v493_v18  ;;  %v344_v52 = vadd.f32 %v1856_v59, %v2573_v51  ;;  %v953_v53 = vpop.permute.xlu1 %952  ;;  %v948_v60 = vpop.permute.xlu0 %947 }
  0xda   :  { %1557 = vst.msk [vmem:[%s3019_s4 + $0xa4] sm:$0xf] %vm1515_vm1, %v1764_v55  ;;  %v504_v54 = vadd.f32 %v1896_v22, %v2573_v51  ;;  %v1161_v56 = vmul.f32 %v948_v60, %v501_v21  ;;  %v335_v57 = vpop.f32.mrf.mxu0  ;;  %v495_v58 = vpop.f32.mrf.mxu1 }
  0xdb   :  { %1522 = vst.msk [vmem:[%s3019_s4 + $0x18] sm:$0xf] %vm1515_vm1, %v1729_v8  ;;  %v1727_v4 = vpack.c.bf16 %v1119_v25, %v1119_v25  ;;  %v1767_v61 = vpack.c.bf16 %v1159_v26, %v1159_v26  ;;  %v1122_v62 = vmul.f32 %v2472_v7, %v344_v52  ;;  %v336_v63 = vadd.f32 %v2573_v51, %v335_v57 }
  0xdc   :  { %v1162_v1 = vmul.f32 %v953_v53, %v504_v54  ;;  %v1769_v5 = vpack.c.bf16 %v1161_v56, %v1161_v56  ;;  %v496_v6 = vadd.f32 %v2573_v51, %v495_v58  ;;  %v1859_v9 = vpop.f32.mrf.mxu0  ;;  %v1899_v10 = vpop.f32.mrf.mxu1 }
  0xdd   :  { %1520 = vst.msk [vmem:[%s3019_s4 + $0x10] sm:$0xf] %vm1515_vm1, %v1727_v4  ;;  %1560 = vst.msk [vmem:[%s3019_s4 + $0xb0] sm:$0xf] %vm1515_vm1, %v1767_v61  ;;  %v1730_v13 = vpack.c.bf16 %v1122_v62, %v1122_v62  ;;  %v1120_v7 = vmul.f32 %v2462_v3, %v336_v63  ;;  %v357_v14 = vadd.f32 %v1859_v9, %v2573_v51  ;;  %v963_v0 = vpop.permute.xlu1 %962  ;;  %v958_v17 = vpop.permute.xlu0 %957 }
  0xde   :  { %v1770_v18 = vpack.c.bf16 %v1162_v1, %v1162_v1  ;;  %1562 = vst.msk [vmem:[%s3019_s4 + $0xb8] sm:$0xf] %vm1515_vm1, %v1769_v5  ;;  %v1160_v55 = vmul.f32 %v943_v2, %v496_v6  ;;  %v348_v21 = vpop.f32.mrf.mxu0  ;;  %v508_v59 = vpop.f32.mrf.mxu1  ;;  %v517_v26 = vadd.f32 %v1899_v10, %v2573_v51 }
  0xdf   :  { %1523 = vst.msk [vmem:[%s3019_s4 + $0x1c] sm:$0xf] %vm1515_vm1, %v1730_v13  ;;  %v1728_v22 = vpack.c.bf16 %v1120_v7, %v1120_v7  ;;  %v1125_v3 = vmul.f32 %v2494_v16, %v357_v14  ;;  %v349_v8 = vadd.f32 %v2573_v51, %v348_v21  ;;  %v509_v25 = vadd.f32 %v2573_v51, %v508_v59 }
  0xe0   :  { %1563 = vst.msk [vmem:[%s3019_s4 + $0xbc] sm:$0xf] %vm1515_vm1, %v1770_v18  ;;  %v1768_v2 = vpack.c.bf16 %v1160_v55, %v1160_v55  ;;  %v1860_v52 = vpop.f32.mrf.mxu0  ;;  %v1900_v53 = vpop.f32.mrf.mxu1 }
  0xe1   :  { %1521 = vst.msk [vmem:[%s3019_s4 + $0x14] sm:$0xf] %vm1515_vm1, %v1728_v22  ;;  %v1733_v16 = vpack.c.bf16 %v1125_v3, %v1125_v3  ;;  %v1123_v60 = vmul.f32 %v2484_v12, %v349_v8  ;;  %v1163_v54 = vmul.f32 %v958_v17, %v509_v25  ;;  %v360_v56 = vadd.f32 %v1860_v52, %v2573_v51  ;;  %v973_v57 = vpop.permute.xlu1 %972  ;;  %v968_v58 = vpop.permute.xlu0 %967 }
  0xe2   :  { %1561 = vst.msk [vmem:[%s3019_s4 + $0xb4] sm:$0xf] %vm1515_vm1, %v1768_v2  ;;  %v520_v4 = vadd.f32 %v1900_v53, %v2573_v51  ;;  %v1165_v61 = vmul.f32 %v968_v58, %v517_v26  ;;  %v351_v62 = vpop.f32.mrf.mxu0  ;;  %v511_v63 = vpop.f32.mrf.mxu1 }
  0xe3   :  { %1526 = vst.msk [vmem:[%s3019_s4 + $0x28] sm:$0xf] %vm1515_vm1, %v1733_v16  ;;  %v1731_v12 = vpack.c.bf16 %v1123_v60, %v1123_v60  ;;  %v1771_v1 = vpack.c.bf16 %v1163_v54, %v1163_v54  ;;  %v1126_v5 = vmul.f32 %v2492_v15, %v360_v56  ;;  %v352_v6 = vadd.f32 %v2573_v51, %v351_v62 }
  0xe4   :  { %v1166_v9 = vmul.f32 %v973_v57, %v520_v4  ;;  %v1773_v10 = vpack.c.bf16 %v1165_v61, %v1165_v61  ;;  %v512_v13 = vadd.f32 %v2573_v51, %v511_v63  ;;  %v1863_v7 = vpop.f32.mrf.mxu0  ;;  %v1903_v14 = vpop.f32.mrf.mxu1 }
  0xe5   :  { %1524 = vst.msk [vmem:[%s3019_s4 + $0x20] sm:$0xf] %vm1515_vm1, %v1731_v12  ;;  %1564 = vst.msk [vmem:[%s3019_s4 + $0xc0] sm:$0xf] %vm1515_vm1, %v1771_v1  ;;  %v1734_v17 = vpack.c.bf16 %v1126_v5, %v1126_v5  ;;  %v1124_v15 = vmul.f32 %v2482_v11, %v352_v6  ;;  %v373_v18 = vadd.f32 %v1863_v7, %v2573_v51  ;;  %v983_v55 = vpop.permute.xlu1 %982  ;;  %v978_v21 = vpop.permute.xlu0 %977 }
  0xe6   :  { %v1774_v59 = vpack.c.bf16 %v1166_v9, %v1166_v9  ;;  %1566 = vst.msk [vmem:[%s3019_s4 + $0xc8] sm:$0xf] %vm1515_vm1, %v1773_v10  ;;  %v1164_v22 = vmul.f32 %v963_v0, %v512_v13  ;;  %v364_v3 = vpop.f32.mrf.mxu0  ;;  %v524_v8 = vpop.f32.mrf.mxu1  ;;  %v533_v52 = vadd.f32 %v1903_v14, %v2573_v51 }
  0xe7   :  { %1527 = vst.msk [vmem:[%s3019_s4 + $0x2c] sm:$0xf] %vm1515_vm1, %v1734_v17  ;;  %v1732_v25 = vpack.c.bf16 %v1124_v15, %v1124_v15  ;;  %v1129_v11 = vmul.f32 %v2514_v24, %v373_v18  ;;  %v365_v2 = vadd.f32 %v2573_v51, %v364_v3  ;;  %v525_v26 = vadd.f32 %v2573_v51, %v524_v8 }
  0xe8   :  { %1567 = vst.msk [vmem:[%s3019_s4 + $0xcc] sm:$0xf] %vm1515_vm1, %v1774_v59  ;;  %v1772_v0 = vpack.c.bf16 %v1164_v22, %v1164_v22  ;;  %v1864_v53 = vpop.f32.mrf.mxu0  ;;  %v1904_v16 = vpop.f32.mrf.mxu1 }
  0xe9   :  { %1525 = vst.msk [vmem:[%s3019_s4 + $0x24] sm:$0xf] %vm1515_vm1, %v1732_v25  ;;  %v1737_v24 = vpack.c.bf16 %v1129_v11, %v1129_v11  ;;  %v1127_v60 = vmul.f32 %v2504_v20, %v365_v2  ;;  %v1167_v54 = vmul.f32 %v978_v21, %v525_v26  ;;  %v376_v56 = vadd.f32 %v1864_v53, %v2573_v51  ;;  %v993_v57 = vpop.permute.xlu1 %992  ;;  %v988_v58 = vpop.permute.xlu0 %987 }
  0xea   :  { %1565 = vst.msk [vmem:[%s3019_s4 + $0xc4] sm:$0xf] %vm1515_vm1, %v1772_v0  ;;  %v536_v4 = vadd.f32 %v1904_v16, %v2573_v51  ;;  %v1169_v61 = vmul.f32 %v988_v58, %v533_v52  ;;  %v367_v62 = vpop.f32.mrf.mxu0  ;;  %v527_v63 = vpop.f32.mrf.mxu1 }
  0xeb   :  { %1530 = vst.msk [vmem:[%s3019_s4 + $0x38] sm:$0xf] %vm1515_vm1, %v1737_v24  ;;  %v1735_v20 = vpack.c.bf16 %v1127_v60, %v1127_v60  ;;  %v1775_v12 = vpack.c.bf16 %v1167_v54, %v1167_v54  ;;  %v1130_v1 = vmul.f32 %v2512_v23, %v376_v56  ;;  %v368_v5 = vadd.f32 %v2573_v51, %v367_v62 }
  0xec   :  { %v1170_v6 = vmul.f32 %v993_v57, %v536_v4  ;;  %v1777_v9 = vpack.c.bf16 %v1169_v61, %v1169_v61  ;;  %v528_v10 = vadd.f32 %v2573_v51, %v527_v63  ;;  %v1867_v13 = vpop.f32.mrf.mxu0  ;;  %v1907_v7 = vpop.f32.mrf.mxu1 }
  0xed   :  { %1528 = vst.msk [vmem:[%s3019_s4 + $0x30] sm:$0xf] %vm1515_vm1, %v1735_v20  ;;  %1568 = vst.msk [vmem:[%s3019_s4 + $0xd0] sm:$0xf] %vm1515_vm1, %v1775_v12  ;;  %v1738_v14 = vpack.c.bf16 %v1130_v1, %v1130_v1  ;;  %v1128_v23 = vmul.f32 %v2502_v19, %v368_v5  ;;  %v389_v17 = vadd.f32 %v1867_v13, %v2573_v51  ;;  %v1003_v15 = vpop.permute.xlu1 %1002  ;;  %v998_v18 = vpop.permute.xlu0 %997 }
  0xee   :  { %v1778_v21 = vpack.c.bf16 %v1170_v6, %v1170_v6  ;;  %1570 = vst.msk [vmem:[%s3019_s4 + $0xd8] sm:$0xf] %vm1515_vm1, %v1777_v9  ;;  %v1168_v59 = vmul.f32 %v983_v55, %v528_v10  ;;  %v380_v22 = vpop.f32.mrf.mxu0  ;;  %v540_v3 = vpop.f32.mrf.mxu1  ;;  %v549_v2 = vadd.f32 %v1907_v7, %v2573_v51 }
  0xef   :  { %1531 = vst.msk [vmem:[%s3019_s4 + $0x3c] sm:$0xf] %vm1515_vm1, %v1738_v14  ;;  %v1736_v8 = vpack.c.bf16 %v1128_v23, %v1128_v23  ;;  %v1133_v19 = vmul.f32 %v2528_v30, %v389_v17  ;;  %v381_v25 = vadd.f32 %v2573_v51, %v380_v22  ;;  %v541_v11 = vadd.f32 %v2573_v51, %v540_v3 }
  0xf0   :  { %1571 = vst.msk [vmem:[%s3019_s4 + $0xdc] sm:$0xf] %vm1515_vm1, %v1778_v21  ;;  %v1776_v55 = vpack.c.bf16 %v1168_v59, %v1168_v59  ;;  %v1868_v26 = vpop.f32.mrf.mxu0  ;;  %v1908_v0 = vpop.f32.mrf.mxu1 }
  0xf1   :  { %1529 = vst.msk [vmem:[%s3019_s4 + $0x34] sm:$0xf] %vm1515_vm1, %v1736_v8  ;;  %v1741_v30 = vpack.c.bf16 %v1133_v19, %v1133_v19  ;;  %v1131_v52 = vmul.f32 %v2524_v28, %v381_v25  ;;  %v1171_v53 = vmul.f32 %v998_v18, %v541_v11  ;;  %v392_v16 = vadd.f32 %v1868_v26, %v2573_v51  ;;  %v1013_v24 = vpop.permute.xlu1 %1012  ;;  %v1008_v60 = vpop.permute.xlu0 %1007 }
  0xf2   :  { %1569 = vst.msk [vmem:[%s3019_s4 + $0xd4] sm:$0xf] %vm1515_vm1, %v1776_v55  ;;  %v552_v54 = vadd.f32 %v1908_v0, %v2573_v51  ;;  %v1173_v56 = vmul.f32 %v1008_v60, %v549_v2  ;;  %v383_v57 = vpop.f32.mrf.mxu0  ;;  %v543_v58 = vpop.f32.mrf.mxu1 }
  0xf3   :  { %1534 = vst.msk [vmem:[%s3019_s4 + $0x48] sm:$0xf] %vm1515_vm1, %v1741_v30  ;;  %v1739_v28 = vpack.c.bf16 %v1131_v52, %v1131_v52  ;;  %v1779_v4 = vpack.c.bf16 %v1171_v53, %v1171_v53  ;;  %v1134_v61 = vmul.f32 %v2526_v29, %v392_v16  ;;  %v384_v62 = vadd.f32 %v2573_v51, %v383_v57 }
  0xf4   :  { %v1174_v63 = vmul.f32 %v1013_v24, %v552_v54  ;;  %v1781_v20 = vpack.c.bf16 %v1173_v56, %v1173_v56  ;;  %v544_v12 = vadd.f32 %v2573_v51, %v543_v58  ;;  %v1871_v1 = vpop.f32.mrf.mxu0  ;;  %v1911_v5 = vpop.f32.mrf.mxu1 }
  0xf5   :  { %1532 = vst.msk [vmem:[%s3019_s4 + $0x40] sm:$0xf] %vm1515_vm1, %v1739_v28  ;;  %1572 = vst.msk [vmem:[%s3019_s4 + $0xe0] sm:$0xf] %vm1515_vm1, %v1779_v4  ;;  %v1742_v6 = vpack.c.bf16 %v1134_v61, %v1134_v61  ;;  %v1132_v29 = vmul.f32 %v2522_v27, %v384_v62  ;;  %v405_v9 = vadd.f32 %v1871_v1, %v2573_v51  ;;  %v1023_v10 = vpop.permute.xlu1 %1022  ;;  %v1018_v13 = vpop.permute.xlu0 %1017 }
  0xf6   :  { %v1782_v7 = vpack.c.bf16 %v1174_v63, %v1174_v63  ;;  %1574 = vst.msk [vmem:[%s3019_s4 + $0xe8] sm:$0xf] %vm1515_vm1, %v1781_v20  ;;  %v1172_v14 = vmul.f32 %v1003_v15, %v544_v12  ;;  %v396_v23 = vpop.f32.mrf.mxu0  ;;  %v556_v17 = vpop.f32.mrf.mxu1  ;;  %v565_v22 = vadd.f32 %v1911_v5, %v2573_v51 }
  0xf7   :  { %1535 = vst.msk [vmem:[%s3019_s4 + $0x4c] sm:$0xf] %vm1515_vm1, %v1742_v6  ;;  %v1740_v18 = vpack.c.bf16 %v1132_v29, %v1132_v29  ;;  %v1137_v27 = vmul.f32 %v2536_v34, %v405_v9  ;;  %v397_v21 = vadd.f32 %v2573_v51, %v396_v23  ;;  %v557_v59 = vadd.f32 %v2573_v51, %v556_v17 }
  0xf8   :  { %1575 = vst.msk [vmem:[%s3019_s4 + $0xec] sm:$0xf] %vm1515_vm1, %v1782_v7  ;;  %v1780_v15 = vpack.c.bf16 %v1172_v14, %v1172_v14  ;;  %v1872_v3 = vpop.f32.mrf.mxu0  ;;  %v1912_v8 = vpop.f32.mrf.mxu1 }
  0xf9   :  { %1533 = vst.msk [vmem:[%s3019_s4 + $0x44] sm:$0xf] %vm1515_vm1, %v1740_v18  ;;  %v1745_v34 = vpack.c.bf16 %v1137_v27, %v1137_v27  ;;  %v1135_v19 = vmul.f32 %v2532_v32, %v397_v21  ;;  %v1175_v25 = vmul.f32 %v1018_v13, %v557_v59  ;;  %v408_v11 = vadd.f32 %v1872_v3, %v2573_v51  ;;  %v1033_v55 = vpop.permute.xlu1 %1032  ;;  %v1028_v2 = vpop.permute.xlu0 %1027 }
  0xfa   :  { %1573 = vst.msk [vmem:[%s3019_s4 + $0xe4] sm:$0xf] %vm1515_vm1, %v1780_v15  ;;  %v568_v26 = vadd.f32 %v1912_v8, %v2573_v51  ;;  %v1177_v0 = vmul.f32 %v1028_v2, %v565_v22  ;;  %v399_v30 = vpop.f32.mrf.mxu0  ;;  %v559_v52 = vpop.f32.mrf.mxu1 }
  0xfb   :  { %1538 = vst.msk [vmem:[%s3019_s4 + $0x58] sm:$0xf] %vm1515_vm1, %v1745_v34  ;;  %v1743_v32 = vpack.c.bf16 %v1135_v19, %v1135_v19  ;;  %v1783_v53 = vpack.c.bf16 %v1175_v25, %v1175_v25  ;;  %v1138_v16 = vmul.f32 %v2534_v33, %v408_v11  ;;  %v400_v24 = vadd.f32 %v2573_v51, %v399_v30 }
  0xfc   :  { %v1178_v60 = vmul.f32 %v1033_v55, %v568_v26  ;;  %v1785_v54 = vpack.c.bf16 %v1177_v0, %v1177_v0  ;;  %v560_v56 = vadd.f32 %v2573_v51, %v559_v52  ;;  %v1875_v57 = vpop.f32.mrf.mxu0  ;;  %v1915_v58 = vpop.f32.mrf.mxu1 }
  0xfd   :  { %1536 = vst.msk [vmem:[%s3019_s4 + $0x50] sm:$0xf] %vm1515_vm1, %v1743_v32  ;;  %1576 = vst.msk [vmem:[%s3019_s4 + $0xf0] sm:$0xf] %vm1515_vm1, %v1783_v53  ;;  %v1746_v28 = vpack.c.bf16 %v1138_v16, %v1138_v16  ;;  %v1136_v33 = vmul.f32 %v2530_v31, %v400_v24  ;;  %v421_v4 = vadd.f32 %v1875_v57, %v2573_v51  ;;  %v1043_v61 = vpop.permute.xlu1 %1042  ;;  %v1038_v62 = vpop.permute.xlu0 %1037 }
  0xfe   :  { %v1786_v63 = vpack.c.bf16 %v1178_v60, %v1178_v60  ;;  %1578 = vst.msk [vmem:[%s3019_s4 + $0xf8] sm:$0xf] %vm1515_vm1, %v1785_v54  ;;  %v1176_v20 = vmul.f32 %v1023_v10, %v560_v56  ;;  %v412_v12 = vpop.f32.mrf.mxu0  ;;  %v572_v1 = vpop.f32.mrf.mxu1  ;;  %v581_v10 = vadd.f32 %v1915_v58, %v2573_v51 }
  0xff   :  { %1539 = vst.msk [vmem:[%s3019_s4 + $0x5c] sm:$0xf] %vm1515_vm1, %v1746_v28  ;;  %v1744_v5 = vpack.c.bf16 %v1136_v33, %v1136_v33  ;;  %v1141_v31 = vmul.f32 %v2544_v38, %v421_v4  ;;  %v413_v6 = vadd.f32 %v2573_v51, %v412_v12  ;;  %v573_v29 = vadd.f32 %v2573_v51, %v572_v1 }
 0x100   :  { %1579 = vst.msk [vmem:[%s3019_s4 + $0xfc] sm:$0xf] %vm1515_vm1, %v1786_v63  ;;  %v1784_v9 = vpack.c.bf16 %v1176_v20, %v1176_v20  ;;  %v1876_v13 = vpop.f32.mrf.mxu0  ;;  %v1916_v7 = vpop.f32.mrf.mxu1 }
 0x101   :  { %1537 = vst.msk [vmem:[%s3019_s4 + $0x54] sm:$0xf] %vm1515_vm1, %v1744_v5  ;;  %v1749_v38 = vpack.c.bf16 %v1141_v31, %v1141_v31  ;;  %v1139_v14 = vmul.f32 %v2540_v36, %v413_v6  ;;  %v1179_v23 = vmul.f32 %v1038_v62, %v573_v29  ;;  %v424_v17 = vadd.f32 %v1876_v13, %v2573_v51  ;;  %v1053_v18 = vpop.permute.xlu1 %1052  ;;  %v1048_v27 = vpop.permute.xlu0 %1047 }
 0x102   :  { %1577 = vst.msk [vmem:[%s3019_s4 + $0xf4] sm:$0xf] %vm1515_vm1, %v1784_v9  ;;  %v584_v21 = vadd.f32 %v1916_v7, %v2573_v51  ;;  %v1181_v59 = vmul.f32 %v1048_v27, %v581_v10  ;;  %v415_v15 = vpop.f32.mrf.mxu0  ;;  %v575_v22 = vpop.f32.mrf.mxu1 }
 0x103   :  { %1542 = vst.msk [vmem:[%s3019_s4 + $0x68] sm:$0xf] %vm1515_vm1, %v1749_v38  ;;  %v1747_v36 = vpack.c.bf16 %v1139_v14, %v1139_v14  ;;  %v1787_v3 = vpack.c.bf16 %v1179_v23, %v1179_v23  ;;  %v1142_v8 = vmul.f32 %v2542_v37, %v424_v17  ;;  %v416_v34 = vadd.f32 %v2573_v51, %v415_v15 }
 0x104   :  { %v1182_v19 = vmul.f32 %v1053_v18, %v584_v21  ;;  %v1789_v25 = vpack.c.bf16 %v1181_v59, %v1181_v59  ;;  %v576_v11 = vadd.f32 %v2573_v51, %v575_v22  ;;  %v1879_v55 = vpop.f32.mrf.mxu0  ;;  %v1919_v2 = vpop.f32.mrf.mxu1 }
 0x105   :  { %1540 = vst.msk [vmem:[%s3019_s4 + $0x60] sm:$0xf] %vm1515_vm1, %v1747_v36  ;;  %1580 = vst.msk [vmem:[%s3019_s4 + $0x100] sm:$0xf] %vm1515_vm1, %v1787_v3  ;;  %v1750_v26 = vpack.c.bf16 %v1142_v8, %v1142_v8  ;;  %v1140_v37 = vmul.f32 %v2538_v35, %v416_v34  ;;  %v437_v0 = vadd.f32 %v1879_v55, %v2573_v51  ;;  %v1063_v30 = vpop.permute.xlu1 %1062  ;;  %v1058_v52 = vpop.permute.xlu0 %1057 }
 0x106   :  { %v1790_v32 = vpack.c.bf16 %v1182_v19, %v1182_v19  ;;  %1582 = vst.msk [vmem:[%s3019_s4 + $0x108] sm:$0xf] %vm1515_vm1, %v1789_v25  ;;  %v1180_v53 = vmul.f32 %v1043_v61, %v576_v11  ;;  %v428_v16 = vpop.f32.mrf.mxu0  ;;  %v588_v24 = vpop.f32.mrf.mxu1  ;;  %v597_v58 = vadd.f32 %v1919_v2, %v2573_v51 }
 0x107   :  { %1543 = vst.msk [vmem:[%s3019_s4 + $0x6c] sm:$0xf] %vm1515_vm1, %v1750_v26  ;;  %v1748_v60 = vpack.c.bf16 %v1140_v37, %v1140_v37  ;;  %v1145_v35 = vmul.f32 %v2552_v42, %v437_v0  ;;  %v429_v54 = vadd.f32 %v2573_v51, %v428_v16  ;;  %v589_v56 = vadd.f32 %v2573_v51, %v588_v24 }
 0x108   :  { %1583 = vst.msk [vmem:[%s3019_s4 + $0x10c] sm:$0xf] %vm1515_vm1, %v1790_v32  ;;  %v1788_v57 = vpack.c.bf16 %v1180_v53, %v1180_v53  ;;  %v1880_v28 = vpop.f32.mrf.mxu0  ;;  %v1920_v33 = vpop.f32.mrf.mxu1 }
 0x109   :  { %1541 = vst.msk [vmem:[%s3019_s4 + $0x64] sm:$0xf] %vm1515_vm1, %v1748_v60  ;;  %v1753_v42 = vpack.c.bf16 %v1145_v35, %v1145_v35  ;;  %v1143_v4 = vmul.f32 %v2548_v40, %v429_v54  ;;  %v1183_v61 = vmul.f32 %v1058_v52, %v589_v56  ;;  %v440_v62 = vadd.f32 %v1880_v28, %v2573_v51  ;;  %v1073_v63 = vpop.permute.xlu1 %1072  ;;  %v1068_v20 = vpop.permute.xlu0 %1067 }
 0x10a   :  { %1581 = vst.msk [vmem:[%s3019_s4 + $0x104] sm:$0xf] %vm1515_vm1, %v1788_v57  ;;  %v600_v12 = vadd.f32 %v1920_v33, %v2573_v51  ;;  %v1185_v1 = vmul.f32 %v1068_v20, %v597_v58  ;;  %v431_v5 = vpop.f32.mrf.mxu0  ;;  %v591_v31 = vpop.f32.mrf.mxu1 }
 0x10b   :  { %1546 = vst.msk [vmem:[%s3019_s4 + $0x78] sm:$0xf] %vm1515_vm1, %v1753_v42  ;;  %v1751_v40 = vpack.c.bf16 %v1143_v4, %v1143_v4  ;;  %v1791_v6 = vpack.c.bf16 %v1183_v61, %v1183_v61  ;;  %v1146_v29 = vmul.f32 %v2550_v41, %v440_v62  ;;  %v432_v9 = vadd.f32 %v2573_v51, %v431_v5 }
 0x10c   :  { %v1186_v10 = vmul.f32 %v1073_v63, %v600_v12  ;;  %v1793_v13 = vpack.c.bf16 %v1185_v1, %v1185_v1  ;;  %v592_v7 = vadd.f32 %v2573_v51, %v591_v31  ;;  %v1883_v38 = vpop.f32.mrf.mxu0  ;;  %v1923_v14 = vpop.f32.mrf.mxu1 }
 0x10d   :  { %1544 = vst.msk [vmem:[%s3019_s4 + $0x70] sm:$0xf] %vm1515_vm1, %v1751_v40  ;;  %1584 = vst.msk [vmem:[%s3019_s4 + $0x110] sm:$0xf] %vm1515_vm1, %v1791_v6  ;;  %v1754_v23 = vpack.c.bf16 %v1146_v29, %v1146_v29  ;;  %v1144_v41 = vmul.f32 %v2546_v39, %v432_v9  ;;  %v453_v17 = vadd.f32 %v1883_v38, %v2573_v51  ;;  %v1083_v18 = vpop.permute.xlu1 %1082  ;;  %v1078_v27 = vpop.permute.xlu0 %1077 }
 0x10e   :  { %v1794_v21 = vpack.c.bf16 %v1186_v10, %v1186_v10  ;;  %1586 = vst.msk [vmem:[%s3019_s4 + $0x118] sm:$0xf] %vm1515_vm1, %v1793_v13  ;;  %v1184_v59 = vmul.f32 %v1063_v30, %v592_v7  ;;  %v444_v15 = vpop.f32.mrf.mxu0  ;;  %v604_v22 = vpop.f32.mrf.mxu1  ;;  %v613_v19 = vadd.f32 %v1923_v14, %v2573_v51 }
 0x10f   :  { %1547 = vst.msk [vmem:[%s3019_s4 + $0x7c] sm:$0xf] %vm1515_vm1, %v1754_v23  ;;  %v1752_v36 = vpack.c.bf16 %v1144_v41, %v1144_v41  ;;  %v1149_v39 = vmul.f32 %v2560_v46, %v453_v17  ;;  %v445_v3 = vadd.f32 %v2573_v51, %v444_v15  ;;  %v605_v8 = vadd.f32 %v2573_v51, %v604_v22 }
 0x110   :  { %1587 = vst.msk [vmem:[%s3019_s4 + $0x11c] sm:$0xf] %vm1515_vm1, %v1794_v21  ;;  %v1792_v34 = vpack.c.bf16 %v1184_v59, %v1184_v59  ;;  %v1884_v25 = vpop.f32.mrf.mxu0  ;;  %v1924_v11 = vpop.f32.mrf.mxu1 }
 0x111   :  { %1545 = vst.msk [vmem:[%s3019_s4 + $0x74] sm:$0xf] %vm1515_vm1, %v1752_v36  ;;  %v1757_v46 = vpack.c.bf16 %v1149_v39, %v1149_v39  ;;  %v1147_v55 = vmul.f32 %v2556_v44, %v445_v3  ;;  %v1187_v2 = vmul.f32 %v1078_v27, %v605_v8  ;;  %v456_v26 = vadd.f32 %v1884_v25, %v2573_v51  ;;  %v1093_v37 = vpop.permute.xlu1 %1092  ;;  %v1088_v0 = vpop.permute.xlu0 %1087 }
 0x112   :  { %1585 = vst.msk [vmem:[%s3019_s4 + $0x114] sm:$0xf] %vm1515_vm1, %v1792_v34  ;;  %v616_v30 = vadd.f32 %v1924_v11, %v2573_v51  ;;  %v1189_v52 = vmul.f32 %v1088_v0, %v613_v19  ;;  %v447_v32 = vpop.f32.mrf.mxu0  ;;  %v607_v53 = vpop.f32.mrf.mxu1 }
 0x113   :  { %1550 = vst.msk [vmem:[%s3019_s4 + $0x88] sm:$0xf] %vm1515_vm1, %v1757_v46  ;;  %v1755_v44 = vpack.c.bf16 %v1147_v55, %v1147_v55  ;;  %v1795_v16 = vpack.c.bf16 %v1187_v2, %v1187_v2  ;;  %v1150_v24 = vmul.f32 %v2558_v45, %v456_v26  ;;  %v448_v60 = vadd.f32 %v2573_v51, %v447_v32 }
 0x114   :  { %v1190_v35 = vmul.f32 %v1093_v37, %v616_v30  ;;  %v1797_v54 = vpack.c.bf16 %v1189_v52, %v1189_v52  ;;  %v608_v56 = vadd.f32 %v2573_v51, %v607_v53  ;;  %v1887_v57 = vpop.f32.mrf.mxu0  ;;  %v1927_v58 = vpop.f32.mrf.mxu1 }
 0x115   :  { %1548 = vst.msk [vmem:[%s3019_s4 + $0x80] sm:$0xf] %vm1515_vm1, %v1755_v44  ;;  %1588 = vst.msk [vmem:[%s3019_s4 + $0x120] sm:$0xf] %vm1515_vm1, %v1795_v16  ;;  %v1758_v28 = vpack.c.bf16 %v1150_v24, %v1150_v24  ;;  %v1148_v45 = vmul.f32 %v2554_v43, %v448_v60  ;;  %v469_v33 = vadd.f32 %v1887_v57, %v2573_v51  ;;  %v1103_v42 = vpop.permute.xlu1 %1102  ;;  %v1098_v4 = vpop.permute.xlu0 %1097 }
 0x116   :  { %v1798_v61 = vpack.c.bf16 %v1190_v35, %v1190_v35  ;;  %1590 = vst.msk [vmem:[%s3019_s4 + $0x128] sm:$0xf] %vm1515_vm1, %v1797_v54  ;;  %v1188_v62 = vmul.f32 %v1083_v18, %v608_v56  ;;  %v460_v63 = vpop.f32.mrf.mxu0  ;;  %v620_v20 = vpop.f32.mrf.mxu1  ;;  %v629_v40 = vadd.f32 %v1927_v58, %v2573_v51 }
 0x117   :  { %1551 = vst.msk [vmem:[%s3019_s4 + $0x8c] sm:$0xf] %vm1515_vm1, %v1758_v28  ;;  %v1756_v12 = vpack.c.bf16 %v1148_v45, %v1148_v45  ;;  %v1153_v43 = vmul.f32 %v2568_v50, %v469_v33  ;;  %v461_v1 = vadd.f32 %v2573_v51, %v460_v63  ;;  %v621_v5 = vadd.f32 %v2573_v51, %v620_v20 }
 0x118   :  { %1591 = vst.msk [vmem:[%s3019_s4 + $0x12c] sm:$0xf] %vm1515_vm1, %v1798_v61  ;;  %v1796_v31 = vpack.c.bf16 %v1188_v62, %v1188_v62  ;;  %v1888_v6 = vpop.f32.mrf.mxu0  ;;  %v1928_v29 = vpop.f32.mrf.mxu1 }
 0x119   :  { %1549 = vst.msk [vmem:[%s3019_s4 + $0x84] sm:$0xf] %vm1515_vm1, %v1756_v12  ;;  %v1761_v50 = vpack.c.bf16 %v1153_v43, %v1153_v43  ;;  %v1151_v9 = vmul.f32 %v2564_v48, %v461_v1  ;;  %v1191_v10 = vmul.f32 %v1098_v4, %v621_v5  ;;  %v472_v13 = vadd.f32 %v1888_v6, %v2573_v51  ;;  %v1113_v7 = vpop.permute.xlu1 %1112  ;;  %v1108_v38 = vpop.permute.xlu0 %1107 }
 0x11a   :  { %1589 = vst.msk [vmem:[%s3019_s4 + $0x124] sm:$0xf] %vm1515_vm1, %v1796_v31  ;;  %v632_v14 = vadd.f32 %v1928_v29, %v2573_v51  ;;  %v1193_v23 = vmul.f32 %v1108_v38, %v629_v40  ;;  %v463_v41 = vpop.f32.mrf.mxu0  ;;  %v623_v17 = vpop.f32.mrf.mxu1 }
 0x11b   :  { %1554 = vst.msk [vmem:[%s3019_s4 + $0x98] sm:$0xf] %vm1515_vm1, %v1761_v50  ;;  %v1759_v48 = vpack.c.bf16 %v1151_v9, %v1151_v9  ;;  %v1799_v18 = vpack.c.bf16 %v1191_v10, %v1191_v10  ;;  %v1154_v27 = vmul.f32 %v2566_v49, %v472_v13  ;;  %v464_v21 = vadd.f32 %v2573_v51, %v463_v41 }
 0x11c   :  { %v1194_v59 = vmul.f32 %v1113_v7, %v632_v14  ;;  %v1801_v15 = vpack.c.bf16 %v1193_v23, %v1193_v23  ;;  %v624_v22 = vadd.f32 %v2573_v51, %v623_v17 }
 0x11d   :  { %1552 = vst.msk [vmem:[%s3019_s4 + $0x90] sm:$0xf] %vm1515_vm1, %v1759_v48  ;;  %1592 = vst.msk [vmem:[%s3019_s4 + $0x130] sm:$0xf] %vm1515_vm1, %v1799_v18  ;;  %v1762_v36 = vpack.c.bf16 %v1154_v27, %v1154_v27  ;;  %v1152_v39 = vmul.f32 %v2562_v47, %v464_v21 }
 0x11e   :  { %v1802_v49 = vpack.c.bf16 %v1194_v59, %v1194_v59  ;;  %1594 = vst.msk [vmem:[%s3019_s4 + $0x138] sm:$0xf] %vm1515_vm1, %v1801_v15  ;;  %v1192_v51 = vmul.f32 %v1103_v42, %v624_v22 }
 0x11f   :  { %1555 = vst.msk [vmem:[%s3019_s4 + $0x9c] sm:$0xf] %vm1515_vm1, %v1762_v36  ;;  %v1760_v3 = vpack.c.bf16 %v1152_v39, %v1152_v39 }
 0x120   :  { %1595 = vst.msk [vmem:[%s3019_s4 + $0x13c] sm:$0xf] %vm1515_vm1, %v1802_v49  ;;  %v1800_v8 = vpack.c.bf16 %v1192_v51, %v1192_v51 }
 0x121   :  { %1553 = vst.msk [vmem:[%s3019_s4 + $0x94] sm:$0xf] %vm1515_vm1, %v1760_v3 }
 0x122   :  { %1593 = vst.msk [vmem:[%s3019_s4 + $0x134] sm:$0xf] %vm1515_vm1, %v1800_v8 }

</bundles_post_ra>
